<compile_context>
chip_gen: v7x
topology: tpu7x:2x2x1
jax: 0.10.0
libtpu: 0.0.40
codegen_flags: <defaults>
</compile_context>

<pallas_src>
import functools
import math

import jax
import jax.numpy as jnp
from jax.experimental import pallas as pl
from jax.experimental.pallas import tpu as pltpu


def _round_up(x, m):
    return ((x + m - 1) // m) * m


def _vmem_limit(est_bytes):
    # generation-aware cap: 75% of physical VMEM (64 MiB on v7x, 128 on v5e/v6e)
    try:
        cap = int(pltpu.get_tpu_info().vmem_capacity_bytes)
    except Exception:  # fall back to the most restrictive generation (v7x)
        cap = 64 * 1024 * 1024
    hi = int(0.75 * cap)
    return int(min(max(2 * est_bytes, 32 * 1024 * 1024), hi))


# ----------------------------- kernel helpers ------------------------------

def _layernorm(x, g, b, eps=1e-6):
    mu = jnp.mean(x, axis=-1, keepdims=True)
    var = jnp.mean((x - mu) ** 2, axis=-1, keepdims=True)
    return (x - mu) * jax.lax.rsqrt(var + eps) * g + b


def _gelu(x):
    # TODO(synk): PyTorch nn.GELU() is the exact erf form; tanh approximation
    # used here (lowers cleanly on the TPU EUP; ~1e-3-level divergence).
    c = math.sqrt(2.0 / math.pi)
    return 0.5 * x * (1.0 + jnp.tanh(c * (x + 0.044715 * x * x * x)))


# ----------------------------- fused ViT kernel ----------------------------

def _fused_vit_kernel(patch_ref, wp_ref, prefix_ref,
                      g1_ref, be1_ref,
                      wq_ref, bq_ref, wk_ref, bk_ref, wv_ref, bv_ref,
                      wo_ref, bo_ref,
                      g2_ref, be2_ref,
                      w1_ref, b1_ref, w2_ref, b2_ref,
                      o_ref, xs_ref, cat_ref,
                      *, num_heads, token_num, t_pad, batch_block, mlp_chunk):
    """grid = (B // batch_block, depth); one step = one layer for `bb` images."""
    l = pl.program_id(1)
    bb = batch_block
    n_valid = token_num + 1          # patch rows 0..N-1 plus the CLS row at N

    # ---- layer 0: fused patch embedding + CLS / positional prefix ---------
    # prefix rows: [pos[1..N] + patch_bias | cls + pos[0] | zeros(padding)]
    @pl.when(l == 0)
    def _():
        pe = jnp.dot(patch_ref[...], wp_ref[...],
                     preferred_element_type=jnp.float32)     # [bb*T_pad, D]
        xs_ref[...] = pe + prefix_ref[...]

    x = xs_ref[...]                                          # [bb*T_pad, D] f32
    rows, d = x.shape
    dh = d // num_heads
    scale = 1.0 / math.sqrt(dh)

    # key-validity bias: a single [1, T_pad] row, broadcast over the scores
    kidx = jax.lax.broadcasted_iota(jnp.int32, (1, t_pad), 1)
    mask_bias = jnp.where(kidx < n_valid, 0.0, -1e30).astype(jnp.float32)

    # ---------------- multi-head self-attention -----------------------------
    h = _layernorm(x, g1_ref[0], be1_ref[0]).astype(jnp.bfloat16)

    # full-width QKV projections (one MXU pass each; heads slice them below)
    q = jnp.dot(h, wq_ref[0], preferred_element_type=jnp.float32) + bq_ref[0]
    k = jnp.dot(h, wk_ref[0], preferred_element_type=jnp.float32) + bk_ref[0]
    v = jnp.dot(h, wv_ref[0], preferred_element_type=jnp.float32) + bv_ref[0]
    qb = q.astype(jnp.bfloat16)
    kb = k.astype(jnp.bfloat16)
    vb = v.astype(jnp.bfloat16)

    for hd in range(num_heads):                 # static unroll over heads
        c0 = hd * dh
        for bi in range(bb):                    # attention stays per-image
            r0 = bi * t_pad
            qh = qb[r0:r0 + t_pad, c0:c0 + dh]
            kh = kb[r0:r0 + t_pad, c0:c0 + dh]
            vh = vb[r0:r0 + t_pad, c0:c0 + dh]
            # q @ k^T without an explicit transpose: contract the last dims
            s = jax.lax.dot_general(
                qh, kh, dimension_numbers=(((1,), (1,)), ((), ())),
                preferred_element_type=jnp.float32) * scale
            s = s + mask_bias
            s = s - jnp.max(s, axis=-1, keepdims=True)
            p = jnp.exp(s)
            inv = pl.reciprocal(jnp.sum(p, axis=-1, keepdims=True), approx=True)
            p = (p * inv).astype(jnp.bfloat16)
            oh = jnp.dot(p, vh, preferred_element_type=jnp.float32)
            cat_ref[r0:r0 + t_pad, c0:c0 + dh] = oh.astype(jnp.bfloat16)

    # one full-width output projection over the concatenated heads
    attn = jnp.dot(cat_ref[...], wo_ref[0], preferred_element_type=jnp.float32)
    x = x + attn + bo_ref[0]

    # ------------------------------- MLP ------------------------------------
    h2 = _layernorm(x, g2_ref[0], be2_ref[0]).astype(jnp.bfloat16)
    w1 = w1_ref[0]
    b1 = b1_ref[0]
    w2 = w2_ref[0]
    hidden = w1.shape[-1]
    mlp = jnp.zeros((rows, d), jnp.float32)
    for c0 in range(0, hidden, mlp_chunk):      # bounds the [rows, hidden] temp
        csl = slice(c0, min(c0 + mlp_chunk, hidden))
        m = jnp.dot(h2, w1[:, csl], preferred_element_type=jnp.float32) + b1[:, csl]
        m = _gelu(m).astype(jnp.bfloat16)
        mlp = mlp + jnp.dot(m, w2[csl, :], preferred_element_type=jnp.float32)
    x = x + mlp + b2_ref[0]

    xs_ref[...] = x

    # ---- last layer: emit patch tokens; CLS + padding rows are dropped -----
    # patch tokens live in rows 0..token_num-1 of each image's segment, so the
    # output store is a sublane-aligned, row-0-based slice.
    @pl.when(l == pl.num_programs(1) - 1)
    def _():
        for bi in range(bb):
            o_ref[bi] = x[bi * t_pad: bi * t_pad + token_num, :]


# ----------------------------- wrapper --------------------------------------

def fused_vit_forward(patches_flat, w_patch, prefix_tiled, layer_params, *,
                      num_heads, token_num, t_pad, batch, batch_block,
                      feature_dim):
    """patches_flat: [B*T_pad, K] bf16 (patch rows 0..N-1 per segment, rest 0),
       w_patch     : [K, D] bf16,
       prefix_tiled: [bb*T_pad, D] f32 (pos + cls + patch-bias slab, bb copies),
       layer_params: tuple of [depth, ...] stacked per-layer arrays."""
    depth = layer_params[0].shape[0]
    K = patches_flat.shape[-1]
    D = feature_dim
    bb = batch_block
    hidden = layer_params[12].shape[-1]
    mlp_chunk = min(hidden, 1024)

    const2 = lambda b, l: (0, 0)
    w_idx = lambda b, l: (l, 0, 0)

    in_specs = [pl.BlockSpec((bb * t_pad, K), lambda b, l: (b, 0)),
                pl.BlockSpec((K, D), const2),            # patch weight resident
                pl.BlockSpec((bb * t_pad, D), const2)]   # prefix (read at l==0)
    in_specs += [pl.BlockSpec((1,) + p.shape[1:], w_idx) for p in layer_params]

    w_bytes = sum(int(math.prod(p.shape[1:])) * p.dtype.itemsize
                  for p in layer_params)
    io_bytes = (bb * t_pad * K * 2 + K * D * 2 + bb * t_pad * D * 4
                + bb * token_num * D * 4)
    scratch_bytes = bb * t_pad * D * 6
    temp_bytes = 4 * bb * t_pad * max(D, mlp_chunk) + 8 * t_pad * t_pad
    est = 2 * (w_bytes + io_bytes) + scratch_bytes + temp_bytes

    return pl.pallas_call(
        functools.partial(_fused_vit_kernel,
                          num_heads=num_heads, token_num=token_num,
                          t_pad=t_pad, batch_block=bb, mlp_chunk=mlp_chunk),
        grid=(batch // bb, depth),
        in_specs=in_specs,
        out_specs=pl.BlockSpec((bb, token_num, D), lambda b, l: (b, 0, 0)),
        out_shape=jax.ShapeDtypeStruct((batch, token_num, D), jnp.float32),
        scratch_shapes=[pltpu.VMEM((bb * t_pad, D), jnp.float32),   # activations
                        pltpu.VMEM((bb * t_pad, D), jnp.bfloat16)], # head concat
        compiler_params=pltpu.CompilerParams(
            dimension_semantics=("parallel", "arbitrary"),
            vmem_limit_bytes=_vmem_limit(est)),
    )(patches_flat, w_patch, prefix_tiled, *layer_params)


# ----------------------------- module ----------------------------------------

class VisualEncoderPallas:
    """Synthetic DINO-ViT Visual_Encoder with deterministic weights.

    (The reference module loads pretrained weights from torch.hub; weights are
    synthesized here so the script is self-contained.)
    """

    def __init__(self, resize_to, patch_size, token_num, feature_dim,
                 in_chans=3, depth=2, num_heads=4, mlp_ratio=4, key=None):
        assert resize_to[0] % patch_size == 0
        assert resize_to[1] % patch_size == 0
        nh, nw = resize_to[0] // patch_size, resize_to[1] // patch_size
        assert nh * nw == token_num
        assert feature_dim % num_heads == 0

        self.patch_size = patch_size
        self.token_num = token_num
        self.feature_dim = feature_dim
        self.num_heads = num_heads
        self.t_pad = _round_up(token_num + 1, 8)

        D = feature_dim
        hidden = mlp_ratio * D
        s = 0.02
        keys = jax.random.split(key, 3 + depth)

        # conv weight [D, C, P, P] flattened (C, P, P)-major -> [C*P*P, D];
        # stored bf16: MXU runs at bf16 rate, DMA bytes halved.
        self.w_patch = (s * jax.random.normal(
            keys[0], (in_chans * patch_size * patch_size, D),
            jnp.float32)).astype(jnp.bfloat16)
        b_patch = jnp.zeros((D,), jnp.float32)

        cls_token = s * jax.random.normal(keys[1], (1, 1, D), jnp.float32)
        pos_embed = s * jax.random.normal(
            keys[2], (1, token_num + 1, D), jnp.float32)

        # prefix slab (token layout: patch rows 0..N-1, CLS at row N, padding
        # rows zero). Patch bias is folded into the patch rows so the kernel's
        # l==0 branch is a single matmul + add.
        prefix = jnp.zeros((self.t_pad, D), jnp.float32)
        prefix = prefix.at[:token_num, :].set(pos_embed[0, 1:, :] + b_patch)
        prefix = prefix.at[token_num, :].set(cls_token[0, 0, :] + pos_embed[0, 0, :])
        self.prefix = prefix

        # per-layer params, stacked as [depth, ...] so the fused pallas_call
        # streams layer l's weights along grid axis 1.
        per_layer = []
        for i in range(depth):
            bk = jax.random.split(keys[3 + i], 6)
            per_layer.append((
                jnp.ones((1, D), jnp.float32),                                    # ln1 g
                jnp.zeros((1, D), jnp.float32),                                   # ln1 b
                (s * jax.random.normal(bk[0], (D, D))).astype(jnp.bfloat16),      # Wq
                jnp.zeros((1, D), jnp.float32),                                   # bq
                (s * jax.random.normal(bk[1], (D, D))).astype(jnp.bfloat16),      # Wk
                jnp.zeros((1, D), jnp.float32),                                   # bk
                (s * jax.random.normal(bk[2], (D, D))).astype(jnp.bfloat16),      # Wv
                jnp.zeros((1, D), jnp.float32),                                   # bv
                (s * jax.random.normal(bk[3], (D, D))).astype(jnp.bfloat16),      # Wo
                jnp.zeros((1, D), jnp.float32),                                   # bo
                jnp.ones((1, D), jnp.float32),                                    # ln2 g
                jnp.zeros((1, D), jnp.float32),                                   # ln2 b
                (s * jax.random.normal(bk[4], (D, hidden))).astype(jnp.bfloat16), # W1
                jnp.zeros((1, hidden), jnp.float32),                              # b1
                (s * jax.random.normal(bk[5], (hidden, D))).astype(jnp.bfloat16), # W2
                jnp.zeros((1, D), jnp.float32),                                   # b2
            ))
        self.layer_params = tuple(
            jnp.stack([layer[j] for layer in per_layer], axis=0)
            for j in range(len(per_layer[0])))

    def __call__(self, frames):
        # frames: NCHW float32
        B, C, H, W = frames.shape
        P = self.patch_size
        nh, nw = H // P, W // P
        N = nh * nw
        D = self.feature_dim
        T = self.t_pad

        # batch block: stack images in the matmul M dimension (fills the MXU
        # and amortizes per-layer weight DMA when the token count is small).
        bb = min(B, max(1, 256 // T))
        while B % bb != 0:
            bb -= 1

        # patchify (pure layout glue): NCHW -> [B, N, C*P*P], pad each image's
        # segment to T rows (rows N..T-1 zero; the CLS row content comes from
        # the prefix inside the kernel), flatten to [B*T, K], bf16 for the MXU.
        patches = frames.reshape(B, C, nh, P, nw, P)
        patches = patches.transpose(0, 2, 4, 1, 3, 5).reshape(B, N, C * P * P)
        patches = jnp.pad(patches, ((0, 0), (0, T - N), (0, 0)))
        patches = patches.reshape(B * T, C * P * P).astype(jnp.bfloat16)

        prefix_tiled = jnp.tile(self.prefix, (bb, 1))          # [bb*T, D] f32

        x = fused_vit_forward(patches, self.w_patch, prefix_tiled,
                              self.layer_params,
                              num_heads=self.num_heads,
                              token_num=self.token_num,
                              t_pad=T, batch=B, batch_block=bb,
                              feature_dim=D)                   # [B, N, D]

        assert x.shape == (B, self.token_num, self.feature_dim)
        return x


# ----------------------------- main ------------------------------------------

if __name__ == "__main__":
    key = jax.random.PRNGKey(0)
    k_frames, k_params = jax.random.split(key)

    # small config consistent with the module: 16x16 image, patch 8 ->
    # 2x2 = 4 patch tokens, feature_dim 32.
    resize_to = (16, 16)
    patch_size = 8
    token_num = 4
    feature_dim = 32

    frames = jax.random.normal(k_frames, (2, 3, 16, 16), jnp.float32)

    enc = VisualEncoderPallas(resize_to, patch_size, token_num, feature_dim,
                              in_chans=3, depth=2, num_heads=4, mlp_ratio=4,
                              key=k_params)

    out = jax.block_until_ready(enc(frames))
    assert out.shape == (2, token_num, feature_dim)
    assert out.dtype == jnp.float32
    assert bool(jnp.all(jnp.isfinite(out)))
    print("KERNEL_OK")
</pallas_src>

<mosaic_0001>
module attributes {stable_mosaic.version = 11 : i64} {
  func.func @_fused_vit_kernel(%arg0: i32, %arg1: i32, %arg2: memref<16x192xbf16, #tpu.memory_space<vmem>>, %arg3: memref<192x32xbf16, #tpu.memory_space<vmem>>, %arg4: memref<16x32xf32, #tpu.memory_space<vmem>>, %arg5: memref<1x1x32xf32, #tpu.memory_space<vmem>>, %arg6: memref<1x1x32xf32, #tpu.memory_space<vmem>>, %arg7: memref<1x32x32xbf16, #tpu.memory_space<vmem>>, %arg8: memref<1x1x32xf32, #tpu.memory_space<vmem>>, %arg9: memref<1x32x32xbf16, #tpu.memory_space<vmem>>, %arg10: memref<1x1x32xf32, #tpu.memory_space<vmem>>, %arg11: memref<1x32x32xbf16, #tpu.memory_space<vmem>>, %arg12: memref<1x1x32xf32, #tpu.memory_space<vmem>>, %arg13: memref<1x32x32xbf16, #tpu.memory_space<vmem>>, %arg14: memref<1x1x32xf32, #tpu.memory_space<vmem>>, %arg15: memref<1x1x32xf32, #tpu.memory_space<vmem>>, %arg16: memref<1x1x32xf32, #tpu.memory_space<vmem>>, %arg17: memref<1x32x128xbf16, #tpu.memory_space<vmem>>, %arg18: memref<1x1x128xf32, #tpu.memory_space<vmem>>, %arg19: memref<1x128x32xbf16, #tpu.memory_space<vmem>>, %arg20: memref<1x1x32xf32, #tpu.memory_space<vmem>>, %arg21: memref<2x4x32xf32, #tpu.memory_space<vmem>>, %arg22: memref<16x32xf32, #tpu.memory_space<vmem>>, %arg23: memref<16x32xbf16, #tpu.memory_space<vmem>>) attributes {dimension_semantics = [#tpu.dimension_semantics<parallel>, #tpu.dimension_semantics<arbitrary>], iteration_bounds = array<i64: 1, 2>, scalar_prefetch = 0 : i64, scratch_operands = 2 : i64, tpu.core_type = #tpu.core_type<tc>, window_params = [{transform_indices = @transform_0, window_bounds = array<i64: 16, 192>}, {pipeline_mode = #tpu.pipeline_mode<synchronous>, transform_indices = @transform_1, window_bounds = array<i64: 192, 32>}, {pipeline_mode = #tpu.pipeline_mode<synchronous>, transform_indices = @transform_2, window_bounds = array<i64: 16, 32>}, {transform_indices = @transform_3, window_bounds = array<i64: 1, 1, 32>}, {transform_indices = @transform_4, window_bounds = array<i64: 1, 1, 32>}, {transform_indices = @transform_5, window_bounds = array<i64: 1, 32, 32>}, {transform_indices = @transform_6, window_bounds = array<i64: 1, 1, 32>}, {transform_indices = @transform_7, window_bounds = array<i64: 1, 32, 32>}, {transform_indices = @transform_8, window_bounds = array<i64: 1, 1, 32>}, {transform_indices = @transform_9, window_bounds = array<i64: 1, 32, 32>}, {transform_indices = @transform_10, window_bounds = array<i64: 1, 1, 32>}, {transform_indices = @transform_11, window_bounds = array<i64: 1, 32, 32>}, {transform_indices = @transform_12, window_bounds = array<i64: 1, 1, 32>}, {transform_indices = @transform_13, window_bounds = array<i64: 1, 1, 32>}, {transform_indices = @transform_14, window_bounds = array<i64: 1, 1, 32>}, {transform_indices = @transform_15, window_bounds = array<i64: 1, 32, 128>}, {transform_indices = @transform_16, window_bounds = array<i64: 1, 1, 128>}, {transform_indices = @transform_17, window_bounds = array<i64: 1, 128, 32>}, {transform_indices = @transform_18, window_bounds = array<i64: 1, 1, 32>}, {transform_indices = @transform_19, window_bounds = array<i64: 2, 4, 32>}]} {
    %c0_i32 = arith.constant 0 : i32
    %0 = arith.cmpi eq, %arg1, %c0_i32 : i32
    %1 = arith.extui %0 : i1 to i32
    %c0_i32_0 = arith.constant 0 : i32
    %2 = arith.cmpi ne, %1, %c0_i32_0 : i32
    scf.if %2 {
      %c0_130 = arith.constant 0 : index
      %c0_131 = arith.constant 0 : index
      %308 = vector.load %arg2[%c0_130, %c0_131] : memref<16x192xbf16, #tpu.memory_space<vmem>>, vector<16x192xbf16>
      %c0_132 = arith.constant 0 : index
      %c0_133 = arith.constant 0 : index
      %309 = vector.load %arg3[%c0_132, %c0_133] : memref<192x32xbf16, #tpu.memory_space<vmem>>, vector<192x32xbf16>
      %cst_134 = arith.constant dense<0.000000e+00> : vector<16x32xf32>
      %310 = tpu.matmul %308, %309, %cst_134 {dimension_numbers = #tpu.dot_dimension_numbers<[1], [0], [0], [1], [0, 0, 1, 1], [], []>} : vector<16x192xbf16>, vector<192x32xbf16>, vector<16x32xf32> -> vector<16x32xf32>
      %c0_135 = arith.constant 0 : index
      %c0_136 = arith.constant 0 : index
      %311 = vector.load %arg4[%c0_135, %c0_136] : memref<16x32xf32, #tpu.memory_space<vmem>>, vector<16x32xf32>
      %312 = arith.addf %310, %311 : vector<16x32xf32>
      %c0_137 = arith.constant 0 : index
      %c0_138 = arith.constant 0 : index
      %313 = vector.load %arg22[%c0_137, %c0_138] : memref<16x32xf32, #tpu.memory_space<vmem>>, vector<16x32xf32>
      tpu.vector_store %arg22[%c0_137, %c0_138], %312 {strides = array<i32>} : memref<16x32xf32, #tpu.memory_space<vmem>>, vector<16x32xf32>,
    } else {
    }
    %c0 = arith.constant 0 : index
    %c0_1 = arith.constant 0 : index
    %3 = vector.load %arg22[%c0, %c0_1] : memref<16x32xf32, #tpu.memory_space<vmem>>, vector<16x32xf32>
    %4 = tpu.iota {dimensions = array<i32: 1>} : vector<1x8xi32>
    %c5_i32 = arith.constant 5 : i32
    %5 = vector.broadcast %c5_i32 : i32 to vector<1x8xi32>
    %6 = arith.cmpi slt, %4, %5 : vector<1x8xi32>
    %cst = arith.constant 0.000000e+00 : f32
    %cst_2 = arith.constant -1.000000e+30 : f32
    %7 = vector.broadcast %cst : f32 to vector<1x8xf32>
    %8 = vector.broadcast %cst_2 : f32 to vector<1x8xf32>
    %9 = arith.select %6, %7, %8 : vector<1x8xi1>, vector<1x8xf32>
    %c0_3 = arith.constant 0 : index
    %c0_4 = arith.constant 0 : index
    %c0_5 = arith.constant 0 : index
    %10 = vector.load %arg5[%c0_3, %c0_4, %c0_5] : memref<1x1x32xf32, #tpu.memory_space<vmem>>, vector<1x1x32xf32>
    %11 = vector.shape_cast %10 : vector<1x1x32xf32> to vector<1x32xf32>
    %c0_6 = arith.constant 0 : index
    %c0_7 = arith.constant 0 : index
    %c0_8 = arith.constant 0 : index
    %12 = vector.load %arg6[%c0_6, %c0_7, %c0_8] : memref<1x1x32xf32, #tpu.memory_space<vmem>>, vector<1x1x32xf32>
    %13 = vector.shape_cast %12 : vector<1x1x32xf32> to vector<1x32xf32>
    %cst_9 = arith.constant dense<0.000000e+00> : vector<16xf32>
    %14 = vector.multi_reduction <add>, %3, %cst_9 [1] : vector<16x32xf32> to vector<16xf32>
    %15 = vector.shape_cast %14 : vector<16xf32> to vector<16x1xf32>
    %cst_10 = arith.constant 3.200000e+01 : f32
    %16 = vector.broadcast %cst_10 : f32 to vector<16x1xf32>
    %17 = arith.divf %15, %16 : vector<16x1xf32>
    %18 = vector.broadcast %17 : vector<16x1xf32> to vector<16x32xf32>
    %19 = arith.subf %3, %18 : vector<16x32xf32>
    %20 = arith.mulf %19, %19 : vector<16x32xf32>
    %cst_11 = arith.constant dense<0.000000e+00> : vector<16xf32>
    %21 = vector.multi_reduction <add>, %20, %cst_11 [1] : vector<16x32xf32> to vector<16xf32>
    %22 = vector.shape_cast %21 : vector<16xf32> to vector<16x1xf32>
    %cst_12 = arith.constant 3.200000e+01 : f32
    %23 = vector.broadcast %cst_12 : f32 to vector<16x1xf32>
    %24 = arith.divf %22, %23 : vector<16x1xf32>
    %25 = vector.broadcast %17 : vector<16x1xf32> to vector<16x32xf32>
    %26 = arith.subf %3, %25 : vector<16x32xf32>
    %cst_13 = arith.constant 9.99999997E-7 : f32
    %27 = vector.broadcast %cst_13 : f32 to vector<16x1xf32>
    %28 = arith.addf %24, %27 : vector<16x1xf32>
    %29 = math.rsqrt %28 : vector<16x1xf32>
    %30 = vector.broadcast %29 : vector<16x1xf32> to vector<16x32xf32>
    %31 = arith.mulf %26, %30 : vector<16x32xf32>
    %32 = vector.broadcast %11 : vector<1x32xf32> to vector<16x32xf32>
    %33 = arith.mulf %31, %32 : vector<16x32xf32>
    %34 = vector.broadcast %13 : vector<1x32xf32> to vector<16x32xf32>
    %35 = arith.addf %33, %34 : vector<16x32xf32>
    %36 = arith.truncf %35 : vector<16x32xf32> to vector<16x32xbf16>
    %c0_14 = arith.constant 0 : index
    %c0_15 = arith.constant 0 : index
    %c0_16 = arith.constant 0 : index
    %37 = vector.load %arg7[%c0_14, %c0_15, %c0_16] : memref<1x32x32xbf16, #tpu.memory_space<vmem>>, vector<1x32x32xbf16>
    %38 = vector.shape_cast %37 : vector<1x32x32xbf16> to vector<32x32xbf16>
    %cst_17 = arith.constant dense<0.000000e+00> : vector<16x32xf32>
    %39 = tpu.matmul %36, %38, %cst_17 {dimension_numbers = #tpu.dot_dimension_numbers<[1], [0], [0], [1], [0, 0, 1, 1], [], []>} : vector<16x32xbf16>, vector<32x32xbf16>, vector<16x32xf32> -> vector<16x32xf32>
    %c0_18 = arith.constant 0 : index
    %c0_19 = arith.constant 0 : index
    %c0_20 = arith.constant 0 : index
    %40 = vector.load %arg8[%c0_18, %c0_19, %c0_20] : memref<1x1x32xf32, #tpu.memory_space<vmem>>, vector<1x1x32xf32>
    %41 = vector.shape_cast %40 : vector<1x1x32xf32> to vector<1x32xf32>
    %42 = vector.broadcast %41 : vector<1x32xf32> to vector<16x32xf32>
    %43 = arith.addf %39, %42 : vector<16x32xf32>
    %c0_21 = arith.constant 0 : index
    %c0_22 = arith.constant 0 : index
    %c0_23 = arith.constant 0 : index
    %44 = vector.load %arg9[%c0_21, %c0_22, %c0_23] : memref<1x32x32xbf16, #tpu.memory_space<vmem>>, vector<1x32x32xbf16>
    %45 = vector.shape_cast %44 : vector<1x32x32xbf16> to vector<32x32xbf16>
    %cst_24 = arith.constant dense<0.000000e+00> : vector<16x32xf32>
    %46 = tpu.matmul %36, %45, %cst_24 {dimension_numbers = #tpu.dot_dimension_numbers<[1], [0], [0], [1], [0, 0, 1, 1], [], []>} : vector<16x32xbf16>, vector<32x32xbf16>, vector<16x32xf32> -> vector<16x32xf32>
    %c0_25 = arith.constant 0 : index
    %c0_26 = arith.constant 0 : index
    %c0_27 = arith.constant 0 : index
    %47 = vector.load %arg10[%c0_25, %c0_26, %c0_27] : memref<1x1x32xf32, #tpu.memory_space<vmem>>, vector<1x1x32xf32>
    %48 = vector.shape_cast %47 : vector<1x1x32xf32> to vector<1x32xf32>
    %49 = vector.broadcast %48 : vector<1x32xf32> to vector<16x32xf32>
    %50 = arith.addf %46, %49 : vector<16x32xf32>
    %c0_28 = arith.constant 0 : index
    %c0_29 = arith.constant 0 : index
    %c0_30 = arith.constant 0 : index
    %51 = vector.load %arg11[%c0_28, %c0_29, %c0_30] : memref<1x32x32xbf16, #tpu.memory_space<vmem>>, vector<1x32x32xbf16>
    %52 = vector.shape_cast %51 : vector<1x32x32xbf16> to vector<32x32xbf16>
    %cst_31 = arith.constant dense<0.000000e+00> : vector<16x32xf32>
    %53 = tpu.matmul %36, %52, %cst_31 {dimension_numbers = #tpu.dot_dimension_numbers<[1], [0], [0], [1], [0, 0, 1, 1], [], []>} : vector<16x32xbf16>, vector<32x32xbf16>, vector<16x32xf32> -> vector<16x32xf32>
    %c0_32 = arith.constant 0 : index
    %c0_33 = arith.constant 0 : index
    %c0_34 = arith.constant 0 : index
    %54 = vector.load %arg12[%c0_32, %c0_33, %c0_34] : memref<1x1x32xf32, #tpu.memory_space<vmem>>, vector<1x1x32xf32>
    %55 = vector.shape_cast %54 : vector<1x1x32xf32> to vector<1x32xf32>
    %56 = vector.broadcast %55 : vector<1x32xf32> to vector<16x32xf32>
    %57 = arith.addf %53, %56 : vector<16x32xf32>
    %58 = arith.truncf %43 : vector<16x32xf32> to vector<16x32xbf16>
    %59 = arith.truncf %50 : vector<16x32xf32> to vector<16x32xbf16>
    %60 = arith.truncf %57 : vector<16x32xf32> to vector<16x32xbf16>
    %61 = vector.extract_strided_slice %58 {offsets = [0, 0], sizes = [8, 8], strides = [1, 1]} : vector<16x32xbf16> to vector<8x8xbf16>
    %62 = vector.extract_strided_slice %59 {offsets = [0, 0], sizes = [8, 8], strides = [1, 1]} : vector<16x32xbf16> to vector<8x8xbf16>
    %63 = vector.extract_strided_slice %60 {offsets = [0, 0], sizes = [8, 8], strides = [1, 1]} : vector<16x32xbf16> to vector<8x8xbf16>
    %cst_35 = arith.constant dense<0.000000e+00> : vector<8x8xf32>
    %64 = tpu.matmul %61, %62, %cst_35 {dimension_numbers = #tpu.dot_dimension_numbers<[1], [1], [0], [0], [0, 0, 1, 0], [], []>} : vector<8x8xbf16>, vector<8x8xbf16>, vector<8x8xf32> -> vector<8x8xf32>
    %cst_36 = arith.constant 0.353553385 : f32
    %65 = vector.broadcast %cst_36 : f32 to vector<8x8xf32>
    %66 = arith.mulf %64, %65 : vector<8x8xf32>
    %67 = vector.broadcast %9 : vector<1x8xf32> to vector<8x8xf32>
    %68 = arith.addf %66, %67 : vector<8x8xf32>
    %cst_37 = arith.constant dense<0xFF800000> : vector<8xf32>
    %69 = vector.multi_reduction <maximumf>, %68, %cst_37 [1] : vector<8x8xf32> to vector<8xf32>
    %70 = vector.shape_cast %69 : vector<8xf32> to vector<8x1xf32>
    %71 = vector.broadcast %70 : vector<8x1xf32> to vector<8x8xf32>
    %72 = arith.subf %68, %71 : vector<8x8xf32>
    %73 = math.exp %72 : vector<8x8xf32>
    %cst_38 = arith.constant dense<0.000000e+00> : vector<8xf32>
    %74 = vector.multi_reduction <add>, %73, %cst_38 [1] : vector<8x8xf32> to vector<8xf32>
    %75 = vector.shape_cast %74 : vector<8xf32> to vector<8x1xf32>
    %76 = tpu.reciprocal %75 {approx = true} : vector<8x1xf32> -> vector<8x1xf32>
    %77 = vector.broadcast %76 : vector<8x1xf32> to vector<8x8xf32>
    %78 = arith.mulf %73, %77 : vector<8x8xf32>
    %79 = arith.truncf %78 : vector<8x8xf32> to vector<8x8xbf16>
    %cst_39 = arith.constant dense<0.000000e+00> : vector<8x8xf32>
    %80 = tpu.matmul %79, %63, %cst_39 {dimension_numbers = #tpu.dot_dimension_numbers<[1], [0], [0], [1], [0, 0, 1, 1], [], []>} : vector<8x8xbf16>, vector<8x8xbf16>, vector<8x8xf32> -> vector<8x8xf32>
    %81 = arith.truncf %80 : vector<8x8xf32> to vector<8x8xbf16>
    %c0_40 = arith.constant 0 : index
    %c0_41 = arith.constant 0 : index
    %82 = vector.load %arg23[%c0_40, %c0_41] : memref<16x32xbf16, #tpu.memory_space<vmem>>, vector<8x8xbf16>
    tpu.vector_store %arg23[%c0_40, %c0_41], %81 {strides = array<i32>} : memref<16x32xbf16, #tpu.memory_space<vmem>>, vector<8x8xbf16>,
    %83 = vector.extract_strided_slice %58 {offsets = [8, 0], sizes = [8, 8], strides = [1, 1]} : vector<16x32xbf16> to vector<8x8xbf16>
    %84 = vector.extract_strided_slice %59 {offsets = [8, 0], sizes = [8, 8], strides = [1, 1]} : vector<16x32xbf16> to vector<8x8xbf16>
    %85 = vector.extract_strided_slice %60 {offsets = [8, 0], sizes = [8, 8], strides = [1, 1]} : vector<16x32xbf16> to vector<8x8xbf16>
    %cst_42 = arith.constant dense<0.000000e+00> : vector<8x8xf32>
    %86 = tpu.matmul %83, %84, %cst_42 {dimension_numbers = #tpu.dot_dimension_numbers<[1], [1], [0], [0], [0, 0, 1, 0], [], []>} : vector<8x8xbf16>, vector<8x8xbf16>, vector<8x8xf32> -> vector<8x8xf32>
    %cst_43 = arith.constant 0.353553385 : f32
    %87 = vector.broadcast %cst_43 : f32 to vector<8x8xf32>
    %88 = arith.mulf %86, %87 : vector<8x8xf32>
    %89 = vector.broadcast %9 : vector<1x8xf32> to vector<8x8xf32>
    %90 = arith.addf %88, %89 : vector<8x8xf32>
    %cst_44 = arith.constant dense<0xFF800000> : vector<8xf32>
    %91 = vector.multi_reduction <maximumf>, %90, %cst_44 [1] : vector<8x8xf32> to vector<8xf32>
    %92 = vector.shape_cast %91 : vector<8xf32> to vector<8x1xf32>
    %93 = vector.broadcast %92 : vector<8x1xf32> to vector<8x8xf32>
    %94 = arith.subf %90, %93 : vector<8x8xf32>
    %95 = math.exp %94 : vector<8x8xf32>
    %cst_45 = arith.constant dense<0.000000e+00> : vector<8xf32>
    %96 = vector.multi_reduction <add>, %95, %cst_45 [1] : vector<8x8xf32> to vector<8xf32>
    %97 = vector.shape_cast %96 : vector<8xf32> to vector<8x1xf32>
    %98 = tpu.reciprocal %97 {approx = true} : vector<8x1xf32> -> vector<8x1xf32>
    %99 = vector.broadcast %98 : vector<8x1xf32> to vector<8x8xf32>
    %100 = arith.mulf %95, %99 : vector<8x8xf32>
    %101 = arith.truncf %100 : vector<8x8xf32> to vector<8x8xbf16>
    %cst_46 = arith.constant dense<0.000000e+00> : vector<8x8xf32>
    %102 = tpu.matmul %101, %85, %cst_46 {dimension_numbers = #tpu.dot_dimension_numbers<[1], [0], [0], [1], [0, 0, 1, 1], [], []>} : vector<8x8xbf16>, vector<8x8xbf16>, vector<8x8xf32> -> vector<8x8xf32>
    %103 = arith.truncf %102 : vector<8x8xf32> to vector<8x8xbf16>
    %c8 = arith.constant 8 : index
    %c0_47 = arith.constant 0 : index
    %104 = vector.load %arg23[%c8, %c0_47] : memref<16x32xbf16, #tpu.memory_space<vmem>>, vector<8x8xbf16>
    tpu.vector_store %arg23[%c8, %c0_47], %103 {strides = array<i32>} : memref<16x32xbf16, #tpu.memory_space<vmem>>, vector<8x8xbf16>,
    %105 = vector.extract_strided_slice %58 {offsets = [0, 8], sizes = [8, 8], strides = [1, 1]} : vector<16x32xbf16> to vector<8x8xbf16>
    %106 = vector.extract_strided_slice %59 {offsets = [0, 8], sizes = [8, 8], strides = [1, 1]} : vector<16x32xbf16> to vector<8x8xbf16>
    %107 = vector.extract_strided_slice %60 {offsets = [0, 8], sizes = [8, 8], strides = [1, 1]} : vector<16x32xbf16> to vector<8x8xbf16>
    %cst_48 = arith.constant dense<0.000000e+00> : vector<8x8xf32>
    %108 = tpu.matmul %105, %106, %cst_48 {dimension_numbers = #tpu.dot_dimension_numbers<[1], [1], [0], [0], [0, 0, 1, 0], [], []>} : vector<8x8xbf16>, vector<8x8xbf16>, vector<8x8xf32> -> vector<8x8xf32>
    %cst_49 = arith.constant 0.353553385 : f32
    %109 = vector.broadcast %cst_49 : f32 to vector<8x8xf32>
    %110 = arith.mulf %108, %109 : vector<8x8xf32>
    %111 = vector.broadcast %9 : vector<1x8xf32> to vector<8x8xf32>
    %112 = arith.addf %110, %111 : vector<8x8xf32>
    %cst_50 = arith.constant dense<0xFF800000> : vector<8xf32>
    %113 = vector.multi_reduction <maximumf>, %112, %cst_50 [1] : vector<8x8xf32> to vector<8xf32>
    %114 = vector.shape_cast %113 : vector<8xf32> to vector<8x1xf32>
    %115 = vector.broadcast %114 : vector<8x1xf32> to vector<8x8xf32>
    %116 = arith.subf %112, %115 : vector<8x8xf32>
    %117 = math.exp %116 : vector<8x8xf32>
    %cst_51 = arith.constant dense<0.000000e+00> : vector<8xf32>
    %118 = vector.multi_reduction <add>, %117, %cst_51 [1] : vector<8x8xf32> to vector<8xf32>
    %119 = vector.shape_cast %118 : vector<8xf32> to vector<8x1xf32>
    %120 = tpu.reciprocal %119 {approx = true} : vector<8x1xf32> -> vector<8x1xf32>
    %121 = vector.broadcast %120 : vector<8x1xf32> to vector<8x8xf32>
    %122 = arith.mulf %117, %121 : vector<8x8xf32>
    %123 = arith.truncf %122 : vector<8x8xf32> to vector<8x8xbf16>
    %cst_52 = arith.constant dense<0.000000e+00> : vector<8x8xf32>
    %124 = tpu.matmul %123, %107, %cst_52 {dimension_numbers = #tpu.dot_dimension_numbers<[1], [0], [0], [1], [0, 0, 1, 1], [], []>} : vector<8x8xbf16>, vector<8x8xbf16>, vector<8x8xf32> -> vector<8x8xf32>
    %125 = arith.truncf %124 : vector<8x8xf32> to vector<8x8xbf16>
    %c0_53 = arith.constant 0 : index
    %c8_54 = arith.constant 8 : index
    %126 = vector.load %arg23[%c0_53, %c8_54] : memref<16x32xbf16, #tpu.memory_space<vmem>>, vector<8x8xbf16>
    tpu.vector_store %arg23[%c0_53, %c8_54], %125 {strides = array<i32>} : memref<16x32xbf16, #tpu.memory_space<vmem>>, vector<8x8xbf16>,
    %127 = vector.extract_strided_slice %58 {offsets = [8, 8], sizes = [8, 8], strides = [1, 1]} : vector<16x32xbf16> to vector<8x8xbf16>
    %128 = vector.extract_strided_slice %59 {offsets = [8, 8], sizes = [8, 8], strides = [1, 1]} : vector<16x32xbf16> to vector<8x8xbf16>
    %129 = vector.extract_strided_slice %60 {offsets = [8, 8], sizes = [8, 8], strides = [1, 1]} : vector<16x32xbf16> to vector<8x8xbf16>
    %cst_55 = arith.constant dense<0.000000e+00> : vector<8x8xf32>
    %130 = tpu.matmul %127, %128, %cst_55 {dimension_numbers = #tpu.dot_dimension_numbers<[1], [1], [0], [0], [0, 0, 1, 0], [], []>} : vector<8x8xbf16>, vector<8x8xbf16>, vector<8x8xf32> -> vector<8x8xf32>
    %cst_56 = arith.constant 0.353553385 : f32
    %131 = vector.broadcast %cst_56 : f32 to vector<8x8xf32>
    %132 = arith.mulf %130, %131 : vector<8x8xf32>
    %133 = vector.broadcast %9 : vector<1x8xf32> to vector<8x8xf32>
    %134 = arith.addf %132, %133 : vector<8x8xf32>
    %cst_57 = arith.constant dense<0xFF800000> : vector<8xf32>
    %135 = vector.multi_reduction <maximumf>, %134, %cst_57 [1] : vector<8x8xf32> to vector<8xf32>
    %136 = vector.shape_cast %135 : vector<8xf32> to vector<8x1xf32>
    %137 = vector.broadcast %136 : vector<8x1xf32> to vector<8x8xf32>
    %138 = arith.subf %134, %137 : vector<8x8xf32>
    %139 = math.exp %138 : vector<8x8xf32>
    %cst_58 = arith.constant dense<0.000000e+00> : vector<8xf32>
    %140 = vector.multi_reduction <add>, %139, %cst_58 [1] : vector<8x8xf32> to vector<8xf32>
    %141 = vector.shape_cast %140 : vector<8xf32> to vector<8x1xf32>
    %142 = tpu.reciprocal %141 {approx = true} : vector<8x1xf32> -> vector<8x1xf32>
    %143 = vector.broadcast %142 : vector<8x1xf32> to vector<8x8xf32>
    %144 = arith.mulf %139, %143 : vector<8x8xf32>
    %145 = arith.truncf %144 : vector<8x8xf32> to vector<8x8xbf16>
    %cst_59 = arith.constant dense<0.000000e+00> : vector<8x8xf32>
    %146 = tpu.matmul %145, %129, %cst_59 {dimension_numbers = #tpu.dot_dimension_numbers<[1], [0], [0], [1], [0, 0, 1, 1], [], []>} : vector<8x8xbf16>, vector<8x8xbf16>, vector<8x8xf32> -> vector<8x8xf32>
    %147 = arith.truncf %146 : vector<8x8xf32> to vector<8x8xbf16>
    %c8_60 = arith.constant 8 : index
    %c8_61 = arith.constant 8 : index
    %148 = vector.load %arg23[%c8_60, %c8_61] : memref<16x32xbf16, #tpu.memory_space<vmem>>, vector<8x8xbf16>
    tpu.vector_store %arg23[%c8_60, %c8_61], %147 {strides = array<i32>} : memref<16x32xbf16, #tpu.memory_space<vmem>>, vector<8x8xbf16>,
    %149 = vector.extract_strided_slice %58 {offsets = [0, 16], sizes = [8, 8], strides = [1, 1]} : vector<16x32xbf16> to vector<8x8xbf16>
    %150 = vector.extract_strided_slice %59 {offsets = [0, 16], sizes = [8, 8], strides = [1, 1]} : vector<16x32xbf16> to vector<8x8xbf16>
    %151 = vector.extract_strided_slice %60 {offsets = [0, 16], sizes = [8, 8], strides = [1, 1]} : vector<16x32xbf16> to vector<8x8xbf16>
    %cst_62 = arith.constant dense<0.000000e+00> : vector<8x8xf32>
    %152 = tpu.matmul %149, %150, %cst_62 {dimension_numbers = #tpu.dot_dimension_numbers<[1], [1], [0], [0], [0, 0, 1, 0], [], []>} : vector<8x8xbf16>, vector<8x8xbf16>, vector<8x8xf32> -> vector<8x8xf32>
    %cst_63 = arith.constant 0.353553385 : f32
    %153 = vector.broadcast %cst_63 : f32 to vector<8x8xf32>
    %154 = arith.mulf %152, %153 : vector<8x8xf32>
    %155 = vector.broadcast %9 : vector<1x8xf32> to vector<8x8xf32>
    %156 = arith.addf %154, %155 : vector<8x8xf32>
    %cst_64 = arith.constant dense<0xFF800000> : vector<8xf32>
    %157 = vector.multi_reduction <maximumf>, %156, %cst_64 [1] : vector<8x8xf32> to vector<8xf32>
    %158 = vector.shape_cast %157 : vector<8xf32> to vector<8x1xf32>
    %159 = vector.broadcast %158 : vector<8x1xf32> to vector<8x8xf32>
    %160 = arith.subf %156, %159 : vector<8x8xf32>
    %161 = math.exp %160 : vector<8x8xf32>
    %cst_65 = arith.constant dense<0.000000e+00> : vector<8xf32>
    %162 = vector.multi_reduction <add>, %161, %cst_65 [1] : vector<8x8xf32> to vector<8xf32>
    %163 = vector.shape_cast %162 : vector<8xf32> to vector<8x1xf32>
    %164 = tpu.reciprocal %163 {approx = true} : vector<8x1xf32> -> vector<8x1xf32>
    %165 = vector.broadcast %164 : vector<8x1xf32> to vector<8x8xf32>
    %166 = arith.mulf %161, %165 : vector<8x8xf32>
    %167 = arith.truncf %166 : vector<8x8xf32> to vector<8x8xbf16>
    %cst_66 = arith.constant dense<0.000000e+00> : vector<8x8xf32>
    %168 = tpu.matmul %167, %151, %cst_66 {dimension_numbers = #tpu.dot_dimension_numbers<[1], [0], [0], [1], [0, 0, 1, 1], [], []>} : vector<8x8xbf16>, vector<8x8xbf16>, vector<8x8xf32> -> vector<8x8xf32>
    %169 = arith.truncf %168 : vector<8x8xf32> to vector<8x8xbf16>
    %c0_67 = arith.constant 0 : index
    %c16 = arith.constant 16 : index
    %170 = vector.load %arg23[%c0_67, %c16] : memref<16x32xbf16, #tpu.memory_space<vmem>>, vector<8x8xbf16>
    tpu.vector_store %arg23[%c0_67, %c16], %169 {strides = array<i32>} : memref<16x32xbf16, #tpu.memory_space<vmem>>, vector<8x8xbf16>,
    %171 = vector.extract_strided_slice %58 {offsets = [8, 16], sizes = [8, 8], strides = [1, 1]} : vector<16x32xbf16> to vector<8x8xbf16>
    %172 = vector.extract_strided_slice %59 {offsets = [8, 16], sizes = [8, 8], strides = [1, 1]} : vector<16x32xbf16> to vector<8x8xbf16>
    %173 = vector.extract_strided_slice %60 {offsets = [8, 16], sizes = [8, 8], strides = [1, 1]} : vector<16x32xbf16> to vector<8x8xbf16>
    %cst_68 = arith.constant dense<0.000000e+00> : vector<8x8xf32>
    %174 = tpu.matmul %171, %172, %cst_68 {dimension_numbers = #tpu.dot_dimension_numbers<[1], [1], [0], [0], [0, 0, 1, 0], [], []>} : vector<8x8xbf16>, vector<8x8xbf16>, vector<8x8xf32> -> vector<8x8xf32>
    %cst_69 = arith.constant 0.353553385 : f32
    %175 = vector.broadcast %cst_69 : f32 to vector<8x8xf32>
    %176 = arith.mulf %174, %175 : vector<8x8xf32>
    %177 = vector.broadcast %9 : vector<1x8xf32> to vector<8x8xf32>
    %178 = arith.addf %176, %177 : vector<8x8xf32>
    %cst_70 = arith.constant dense<0xFF800000> : vector<8xf32>
    %179 = vector.multi_reduction <maximumf>, %178, %cst_70 [1] : vector<8x8xf32> to vector<8xf32>
    %180 = vector.shape_cast %179 : vector<8xf32> to vector<8x1xf32>
    %181 = vector.broadcast %180 : vector<8x1xf32> to vector<8x8xf32>
    %182 = arith.subf %178, %181 : vector<8x8xf32>
    %183 = math.exp %182 : vector<8x8xf32>
    %cst_71 = arith.constant dense<0.000000e+00> : vector<8xf32>
    %184 = vector.multi_reduction <add>, %183, %cst_71 [1] : vector<8x8xf32> to vector<8xf32>
    %185 = vector.shape_cast %184 : vector<8xf32> to vector<8x1xf32>
    %186 = tpu.reciprocal %185 {approx = true} : vector<8x1xf32> -> vector<8x1xf32>
    %187 = vector.broadcast %186 : vector<8x1xf32> to vector<8x8xf32>
    %188 = arith.mulf %183, %187 : vector<8x8xf32>
    %189 = arith.truncf %188 : vector<8x8xf32> to vector<8x8xbf16>
    %cst_72 = arith.constant dense<0.000000e+00> : vector<8x8xf32>
    %190 = tpu.matmul %189, %173, %cst_72 {dimension_numbers = #tpu.dot_dimension_numbers<[1], [0], [0], [1], [0, 0, 1, 1], [], []>} : vector<8x8xbf16>, vector<8x8xbf16>, vector<8x8xf32> -> vector<8x8xf32>
    %191 = arith.truncf %190 : vector<8x8xf32> to vector<8x8xbf16>
    %c8_73 = arith.constant 8 : index
    %c16_74 = arith.constant 16 : index
    %192 = vector.load %arg23[%c8_73, %c16_74] : memref<16x32xbf16, #tpu.memory_space<vmem>>, vector<8x8xbf16>
    tpu.vector_store %arg23[%c8_73, %c16_74], %191 {strides = array<i32>} : memref<16x32xbf16, #tpu.memory_space<vmem>>, vector<8x8xbf16>,
    %193 = vector.extract_strided_slice %58 {offsets = [0, 24], sizes = [8, 8], strides = [1, 1]} : vector<16x32xbf16> to vector<8x8xbf16>
    %194 = vector.extract_strided_slice %59 {offsets = [0, 24], sizes = [8, 8], strides = [1, 1]} : vector<16x32xbf16> to vector<8x8xbf16>
    %195 = vector.extract_strided_slice %60 {offsets = [0, 24], sizes = [8, 8], strides = [1, 1]} : vector<16x32xbf16> to vector<8x8xbf16>
    %cst_75 = arith.constant dense<0.000000e+00> : vector<8x8xf32>
    %196 = tpu.matmul %193, %194, %cst_75 {dimension_numbers = #tpu.dot_dimension_numbers<[1], [1], [0], [0], [0, 0, 1, 0], [], []>} : vector<8x8xbf16>, vector<8x8xbf16>, vector<8x8xf32> -> vector<8x8xf32>
    %cst_76 = arith.constant 0.353553385 : f32
    %197 = vector.broadcast %cst_76 : f32 to vector<8x8xf32>
    %198 = arith.mulf %196, %197 : vector<8x8xf32>
    %199 = vector.broadcast %9 : vector<1x8xf32> to vector<8x8xf32>
    %200 = arith.addf %198, %199 : vector<8x8xf32>
    %cst_77 = arith.constant dense<0xFF800000> : vector<8xf32>
    %201 = vector.multi_reduction <maximumf>, %200, %cst_77 [1] : vector<8x8xf32> to vector<8xf32>
    %202 = vector.shape_cast %201 : vector<8xf32> to vector<8x1xf32>
    %203 = vector.broadcast %202 : vector<8x1xf32> to vector<8x8xf32>
    %204 = arith.subf %200, %203 : vector<8x8xf32>
    %205 = math.exp %204 : vector<8x8xf32>
    %cst_78 = arith.constant dense<0.000000e+00> : vector<8xf32>
    %206 = vector.multi_reduction <add>, %205, %cst_78 [1] : vector<8x8xf32> to vector<8xf32>
    %207 = vector.shape_cast %206 : vector<8xf32> to vector<8x1xf32>
    %208 = tpu.reciprocal %207 {approx = true} : vector<8x1xf32> -> vector<8x1xf32>
    %209 = vector.broadcast %208 : vector<8x1xf32> to vector<8x8xf32>
    %210 = arith.mulf %205, %209 : vector<8x8xf32>
    %211 = arith.truncf %210 : vector<8x8xf32> to vector<8x8xbf16>
    %cst_79 = arith.constant dense<0.000000e+00> : vector<8x8xf32>
    %212 = tpu.matmul %211, %195, %cst_79 {dimension_numbers = #tpu.dot_dimension_numbers<[1], [0], [0], [1], [0, 0, 1, 1], [], []>} : vector<8x8xbf16>, vector<8x8xbf16>, vector<8x8xf32> -> vector<8x8xf32>
    %213 = arith.truncf %212 : vector<8x8xf32> to vector<8x8xbf16>
    %c0_80 = arith.constant 0 : index
    %c24 = arith.constant 24 : index
    %214 = vector.load %arg23[%c0_80, %c24] : memref<16x32xbf16, #tpu.memory_space<vmem>>, vector<8x8xbf16>
    tpu.vector_store %arg23[%c0_80, %c24], %213 {strides = array<i32>} : memref<16x32xbf16, #tpu.memory_space<vmem>>, vector<8x8xbf16>,
    %215 = vector.extract_strided_slice %58 {offsets = [8, 24], sizes = [8, 8], strides = [1, 1]} : vector<16x32xbf16> to vector<8x8xbf16>
    %216 = vector.extract_strided_slice %59 {offsets = [8, 24], sizes = [8, 8], strides = [1, 1]} : vector<16x32xbf16> to vector<8x8xbf16>
    %217 = vector.extract_strided_slice %60 {offsets = [8, 24], sizes = [8, 8], strides = [1, 1]} : vector<16x32xbf16> to vector<8x8xbf16>
    %cst_81 = arith.constant dense<0.000000e+00> : vector<8x8xf32>
    %218 = tpu.matmul %215, %216, %cst_81 {dimension_numbers = #tpu.dot_dimension_numbers<[1], [1], [0], [0], [0, 0, 1, 0], [], []>} : vector<8x8xbf16>, vector<8x8xbf16>, vector<8x8xf32> -> vector<8x8xf32>
    %cst_82 = arith.constant 0.353553385 : f32
    %219 = vector.broadcast %cst_82 : f32 to vector<8x8xf32>
    %220 = arith.mulf %218, %219 : vector<8x8xf32>
    %221 = vector.broadcast %9 : vector<1x8xf32> to vector<8x8xf32>
    %222 = arith.addf %220, %221 : vector<8x8xf32>
    %cst_83 = arith.constant dense<0xFF800000> : vector<8xf32>
    %223 = vector.multi_reduction <maximumf>, %222, %cst_83 [1] : vector<8x8xf32> to vector<8xf32>
    %224 = vector.shape_cast %223 : vector<8xf32> to vector<8x1xf32>
    %225 = vector.broadcast %224 : vector<8x1xf32> to vector<8x8xf32>
    %226 = arith.subf %222, %225 : vector<8x8xf32>
    %227 = math.exp %226 : vector<8x8xf32>
    %cst_84 = arith.constant dense<0.000000e+00> : vector<8xf32>
    %228 = vector.multi_reduction <add>, %227, %cst_84 [1] : vector<8x8xf32> to vector<8xf32>
    %229 = vector.shape_cast %228 : vector<8xf32> to vector<8x1xf32>
    %230 = tpu.reciprocal %229 {approx = true} : vector<8x1xf32> -> vector<8x1xf32>
    %231 = vector.broadcast %230 : vector<8x1xf32> to vector<8x8xf32>
    %232 = arith.mulf %227, %231 : vector<8x8xf32>
    %233 = arith.truncf %232 : vector<8x8xf32> to vector<8x8xbf16>
    %cst_85 = arith.constant dense<0.000000e+00> : vector<8x8xf32>
    %234 = tpu.matmul %233, %217, %cst_85 {dimension_numbers = #tpu.dot_dimension_numbers<[1], [0], [0], [1], [0, 0, 1, 1], [], []>} : vector<8x8xbf16>, vector<8x8xbf16>, vector<8x8xf32> -> vector<8x8xf32>
    %235 = arith.truncf %234 : vector<8x8xf32> to vector<8x8xbf16>
    %c8_86 = arith.constant 8 : index
    %c24_87 = arith.constant 24 : index
    %236 = vector.load %arg23[%c8_86, %c24_87] : memref<16x32xbf16, #tpu.memory_space<vmem>>, vector<8x8xbf16>
    tpu.vector_store %arg23[%c8_86, %c24_87], %235 {strides = array<i32>} : memref<16x32xbf16, #tpu.memory_space<vmem>>, vector<8x8xbf16>,
    %c0_88 = arith.constant 0 : index
    %c0_89 = arith.constant 0 : index
    %237 = vector.load %arg23[%c0_88, %c0_89] : memref<16x32xbf16, #tpu.memory_space<vmem>>, vector<16x32xbf16>
    %c0_90 = arith.constant 0 : index
    %c0_91 = arith.constant 0 : index
    %c0_92 = arith.constant 0 : index
    %238 = vector.load %arg13[%c0_90, %c0_91, %c0_92] : memref<1x32x32xbf16, #tpu.memory_space<vmem>>, vector<1x32x32xbf16>
    %239 = vector.shape_cast %238 : vector<1x32x32xbf16> to vector<32x32xbf16>
    %cst_93 = arith.constant dense<0.000000e+00> : vector<16x32xf32>
    %240 = tpu.matmul %237, %239, %cst_93 {dimension_numbers = #tpu.dot_dimension_numbers<[1], [0], [0], [1], [0, 0, 1, 1], [], []>} : vector<16x32xbf16>, vector<32x32xbf16>, vector<16x32xf32> -> vector<16x32xf32>
    %241 = arith.addf %3, %240 : vector<16x32xf32>
    %c0_94 = arith.constant 0 : index
    %c0_95 = arith.constant 0 : index
    %c0_96 = arith.constant 0 : index
    %242 = vector.load %arg14[%c0_94, %c0_95, %c0_96] : memref<1x1x32xf32, #tpu.memory_space<vmem>>, vector<1x1x32xf32>
    %243 = vector.shape_cast %242 : vector<1x1x32xf32> to vector<1x32xf32>
    %244 = vector.broadcast %243 : vector<1x32xf32> to vector<16x32xf32>
    %245 = arith.addf %241, %244 : vector<16x32xf32>
    %c0_97 = arith.constant 0 : index
    %c0_98 = arith.constant 0 : index
    %c0_99 = arith.constant 0 : index
    %246 = vector.load %arg15[%c0_97, %c0_98, %c0_99] : memref<1x1x32xf32, #tpu.memory_space<vmem>>, vector<1x1x32xf32>
    %247 = vector.shape_cast %246 : vector<1x1x32xf32> to vector<1x32xf32>
    %c0_100 = arith.constant 0 : index
    %c0_101 = arith.constant 0 : index
    %c0_102 = arith.constant 0 : index
    %248 = vector.load %arg16[%c0_100, %c0_101, %c0_102] : memref<1x1x32xf32, #tpu.memory_space<vmem>>, vector<1x1x32xf32>
    %249 = vector.shape_cast %248 : vector<1x1x32xf32> to vector<1x32xf32>
    %cst_103 = arith.constant dense<0.000000e+00> : vector<16xf32>
    %250 = vector.multi_reduction <add>, %245, %cst_103 [1] : vector<16x32xf32> to vector<16xf32>
    %251 = vector.shape_cast %250 : vector<16xf32> to vector<16x1xf32>
    %cst_104 = arith.constant 3.200000e+01 : f32
    %252 = vector.broadcast %cst_104 : f32 to vector<16x1xf32>
    %253 = arith.divf %251, %252 : vector<16x1xf32>
    %254 = vector.broadcast %253 : vector<16x1xf32> to vector<16x32xf32>
    %255 = arith.subf %245, %254 : vector<16x32xf32>
    %256 = arith.mulf %255, %255 : vector<16x32xf32>
    %cst_105 = arith.constant dense<0.000000e+00> : vector<16xf32>
    %257 = vector.multi_reduction <add>, %256, %cst_105 [1] : vector<16x32xf32> to vector<16xf32>
    %258 = vector.shape_cast %257 : vector<16xf32> to vector<16x1xf32>
    %cst_106 = arith.constant 3.200000e+01 : f32
    %259 = vector.broadcast %cst_106 : f32 to vector<16x1xf32>
    %260 = arith.divf %258, %259 : vector<16x1xf32>
    %261 = vector.broadcast %253 : vector<16x1xf32> to vector<16x32xf32>
    %262 = arith.subf %245, %261 : vector<16x32xf32>
    %cst_107 = arith.constant 9.99999997E-7 : f32
    %263 = vector.broadcast %cst_107 : f32 to vector<16x1xf32>
    %264 = arith.addf %260, %263 : vector<16x1xf32>
    %265 = math.rsqrt %264 : vector<16x1xf32>
    %266 = vector.broadcast %265 : vector<16x1xf32> to vector<16x32xf32>
    %267 = arith.mulf %262, %266 : vector<16x32xf32>
    %268 = vector.broadcast %247 : vector<1x32xf32> to vector<16x32xf32>
    %269 = arith.mulf %267, %268 : vector<16x32xf32>
    %270 = vector.broadcast %249 : vector<1x32xf32> to vector<16x32xf32>
    %271 = arith.addf %269, %270 : vector<16x32xf32>
    %272 = arith.truncf %271 : vector<16x32xf32> to vector<16x32xbf16>
    %c0_108 = arith.constant 0 : index
    %c0_109 = arith.constant 0 : index
    %c0_110 = arith.constant 0 : index
    %273 = vector.load %arg17[%c0_108, %c0_109, %c0_110] : memref<1x32x128xbf16, #tpu.memory_space<vmem>>, vector<1x32x128xbf16>
    %274 = vector.shape_cast %273 : vector<1x32x128xbf16> to vector<32x128xbf16>
    %c0_111 = arith.constant 0 : index
    %c0_112 = arith.constant 0 : index
    %c0_113 = arith.constant 0 : index
    %275 = vector.load %arg18[%c0_111, %c0_112, %c0_113] : memref<1x1x128xf32, #tpu.memory_space<vmem>>, vector<1x1x128xf32>
    %276 = vector.shape_cast %275 : vector<1x1x128xf32> to vector<1x128xf32>
    %c0_114 = arith.constant 0 : index
    %c0_115 = arith.constant 0 : index
    %c0_116 = arith.constant 0 : index
    %277 = vector.load %arg19[%c0_114, %c0_115, %c0_116] : memref<1x128x32xbf16, #tpu.memory_space<vmem>>, vector<1x128x32xbf16>
    %278 = vector.shape_cast %277 : vector<1x128x32xbf16> to vector<128x32xbf16>
    %cst_117 = arith.constant 0.000000e+00 : f32
    %279 = vector.broadcast %cst_117 : f32 to vector<16x32xf32>
    %cst_118 = arith.constant dense<0.000000e+00> : vector<16x128xf32>
    %280 = tpu.matmul %272, %274, %cst_118 {dimension_numbers = #tpu.dot_dimension_numbers<[1], [0], [0], [1], [0, 0, 1, 1], [], []>} : vector<16x32xbf16>, vector<32x128xbf16>, vector<16x128xf32> -> vector<16x128xf32>
    %281 = vector.broadcast %276 : vector<1x128xf32> to vector<16x128xf32>
    %282 = arith.addf %280, %281 : vector<16x128xf32>
    %cst_119 = arith.constant 5.000000e-01 : f32
    %283 = vector.broadcast %cst_119 : f32 to vector<16x128xf32>
    %284 = arith.mulf %283, %282 : vector<16x128xf32>
    %cst_120 = arith.constant 4.471500e-02 : f32
    %285 = vector.broadcast %cst_120 : f32 to vector<16x128xf32>
    %286 = arith.mulf %285, %282 : vector<16x128xf32>
    %287 = arith.mulf %286, %282 : vector<16x128xf32>
    %288 = arith.mulf %287, %282 : vector<16x128xf32>
    %289 = arith.addf %282, %288 : vector<16x128xf32>
    %cst_121 = arith.constant 0.797884583 : f32
    %290 = vector.broadcast %cst_121 : f32 to vector<16x128xf32>
    %291 = arith.mulf %290, %289 : vector<16x128xf32>
    %292 = math.tanh %291 : vector<16x128xf32>
    %cst_122 = arith.constant 1.000000e+00 : f32
    %293 = vector.broadcast %cst_122 : f32 to vector<16x128xf32>
    %294 = arith.addf %293, %292 : vector<16x128xf32>
    %295 = arith.mulf %284, %294 : vector<16x128xf32>
    %296 = arith.truncf %295 : vector<16x128xf32> to vector<16x128xbf16>
    %cst_123 = arith.constant dense<0.000000e+00> : vector<16x32xf32>
    %297 = tpu.matmul %296, %278, %cst_123 {dimension_numbers = #tpu.dot_dimension_numbers<[1], [0], [0], [1], [0, 0, 1, 1], [], []>} : vector<16x128xbf16>, vector<128x32xbf16>, vector<16x32xf32> -> vector<16x32xf32>
    %298 = arith.addf %279, %297 : vector<16x32xf32>
    %299 = arith.addf %245, %298 : vector<16x32xf32>
    %c0_124 = arith.constant 0 : index
    %c0_125 = arith.constant 0 : index
    %c0_126 = arith.constant 0 : index
    %300 = vector.load %arg20[%c0_124, %c0_125, %c0_126] : memref<1x1x32xf32, #tpu.memory_space<vmem>>, vector<1x1x32xf32>
    %301 = vector.shape_cast %300 : vector<1x1x32xf32> to vector<1x32xf32>
    %302 = vector.broadcast %301 : vector<1x32xf32> to vector<16x32xf32>
    %303 = arith.addf %299, %302 : vector<16x32xf32>
    %c0_127 = arith.constant 0 : index
    %c0_128 = arith.constant 0 : index
    %304 = vector.load %arg22[%c0_127, %c0_128] : memref<16x32xf32, #tpu.memory_space<vmem>>, vector<16x32xf32>
    tpu.vector_store %arg22[%c0_127, %c0_128], %303 {strides = array<i32>} : memref<16x32xf32, #tpu.memory_space<vmem>>, vector<16x32xf32>,
    %c1_i32 = arith.constant 1 : i32
    %305 = arith.cmpi eq, %arg1, %c1_i32 : i32
    %306 = arith.extui %305 : i1 to i32
    %c0_i32_129 = arith.constant 0 : i32
    %307 = arith.cmpi ne, %306, %c0_i32_129 : i32
    scf.if %307 {
      %308 = vector.extract_strided_slice %303 {offsets = [0, 0], sizes = [4, 32], strides = [1, 1]} : vector<16x32xf32> to vector<4x32xf32>
      %c0_130 = arith.constant 0 : index
      %c0_131 = arith.constant 0 : index
      %c0_132 = arith.constant 0 : index
      %309 = vector.load %arg21[%c0_130, %c0_131, %c0_132] : memref<2x4x32xf32, #tpu.memory_space<vmem>>, vector<1x4x32xf32>
      %310 = vector.shape_cast %309 : vector<1x4x32xf32> to vector<4x32xf32>
      %311 = vector.shape_cast %308 : vector<4x32xf32> to vector<1x4x32xf32>
      tpu.vector_store %arg21[%c0_130, %c0_131, %c0_132], %311 {strides = array<i32>} : memref<2x4x32xf32, #tpu.memory_space<vmem>>, vector<1x4x32xf32>,
      %312 = vector.extract_strided_slice %303 {offsets = [8, 0], sizes = [4, 32], strides = [1, 1]} : vector<16x32xf32> to vector<4x32xf32>
      %c1 = arith.constant 1 : index
      %c0_133 = arith.constant 0 : index
      %c0_134 = arith.constant 0 : index
      %313 = vector.load %arg21[%c1, %c0_133, %c0_134] : memref<2x4x32xf32, #tpu.memory_space<vmem>>, vector<1x4x32xf32>
      %314 = vector.shape_cast %313 : vector<1x4x32xf32> to vector<4x32xf32>
      %315 = vector.shape_cast %312 : vector<4x32xf32> to vector<1x4x32xf32>
      tpu.vector_store %arg21[%c1, %c0_133, %c0_134], %315 {strides = array<i32>} : memref<2x4x32xf32, #tpu.memory_space<vmem>>, vector<1x4x32xf32>,
    } else {
    }
    return
  }
  func.func @transform_0(%arg0: i32, %arg1: i32) -> (i32, i32) {
    %c0_i32 = arith.constant 0 : i32
    %c0_i32_0 = arith.constant 0 : i32
    return %arg0, %c0_i32 : i32, i32
  }
  func.func @transform_1(%arg0: i32, %arg1: i32) -> (i32, i32) {
    %c0_i32 = arith.constant 0 : i32
    %c0_i32_0 = arith.constant 0 : i32
    %c0_i32_1 = arith.constant 0 : i32
    return %c0_i32, %c0_i32_0 : i32, i32
  }
  func.func @transform_2(%arg0: i32, %arg1: i32) -> (i32, i32) {
    %c0_i32 = arith.constant 0 : i32
    %c0_i32_0 = arith.constant 0 : i32
    %c0_i32_1 = arith.constant 0 : i32
    return %c0_i32, %c0_i32_0 : i32, i32
  }
  func.func @transform_3(%arg0: i32, %arg1: i32) -> (i32, i32, i32) {
    %c0_i32 = arith.constant 0 : i32
    %c0_i32_0 = arith.constant 0 : i32
    %c0_i32_1 = arith.constant 0 : i32
    return %arg1, %c0_i32, %c0_i32_0 : i32, i32, i32
  }
  func.func @transform_4(%arg0: i32, %arg1: i32) -> (i32, i32, i32) {
    %c0_i32 = arith.constant 0 : i32
    %c0_i32_0 = arith.constant 0 : i32
    %c0_i32_1 = arith.constant 0 : i32
    return %arg1, %c0_i32, %c0_i32_0 : i32, i32, i32
  }
  func.func @transform_5(%arg0: i32, %arg1: i32) -> (i32, i32, i32) {
    %c0_i32 = arith.constant 0 : i32
    %c0_i32_0 = arith.constant 0 : i32
    %c0_i32_1 = arith.constant 0 : i32
    return %arg1, %c0_i32, %c0_i32_0 : i32, i32, i32
  }
  func.func @transform_6(%arg0: i32, %arg1: i32) -> (i32, i32, i32) {
    %c0_i32 = arith.constant 0 : i32
    %c0_i32_0 = arith.constant 0 : i32
    %c0_i32_1 = arith.constant 0 : i32
    return %arg1, %c0_i32, %c0_i32_0 : i32, i32, i32
  }
  func.func @transform_7(%arg0: i32, %arg1: i32) -> (i32, i32, i32) {
    %c0_i32 = arith.constant 0 : i32
    %c0_i32_0 = arith.constant 0 : i32
    %c0_i32_1 = arith.constant 0 : i32
    return %arg1, %c0_i32, %c0_i32_0 : i32, i32, i32
  }
  func.func @transform_8(%arg0: i32, %arg1: i32) -> (i32, i32, i32) {
    %c0_i32 = arith.constant 0 : i32
    %c0_i32_0 = arith.constant 0 : i32
    %c0_i32_1 = arith.constant 0 : i32
    return %arg1, %c0_i32, %c0_i32_0 : i32, i32, i32
  }
  func.func @transform_9(%arg0: i32, %arg1: i32) -> (i32, i32, i32) {
    %c0_i32 = arith.constant 0 : i32
    %c0_i32_0 = arith.constant 0 : i32
    %c0_i32_1 = arith.constant 0 : i32
    return %arg1, %c0_i32, %c0_i32_0 : i32, i32, i32
  }
  func.func @transform_10(%arg0: i32, %arg1: i32) -> (i32, i32, i32) {
    %c0_i32 = arith.constant 0 : i32
    %c0_i32_0 = arith.constant 0 : i32
    %c0_i32_1 = arith.constant 0 : i32
    return %arg1, %c0_i32, %c0_i32_0 : i32, i32, i32
  }
  func.func @transform_11(%arg0: i32, %arg1: i32) -> (i32, i32, i32) {
    %c0_i32 = arith.constant 0 : i32
    %c0_i32_0 = arith.constant 0 : i32
    %c0_i32_1 = arith.constant 0 : i32
    return %arg1, %c0_i32, %c0_i32_0 : i32, i32, i32
  }
  func.func @transform_12(%arg0: i32, %arg1: i32) -> (i32, i32, i32) {
    %c0_i32 = arith.constant 0 : i32
    %c0_i32_0 = arith.constant 0 : i32
    %c0_i32_1 = arith.constant 0 : i32
    return %arg1, %c0_i32, %c0_i32_0 : i32, i32, i32
  }
  func.func @transform_13(%arg0: i32, %arg1: i32) -> (i32, i32, i32) {
    %c0_i32 = arith.constant 0 : i32
    %c0_i32_0 = arith.constant 0 : i32
    %c0_i32_1 = arith.constant 0 : i32
    return %arg1, %c0_i32, %c0_i32_0 : i32, i32, i32
  }
  func.func @transform_14(%arg0: i32, %arg1: i32) -> (i32, i32, i32) {
    %c0_i32 = arith.constant 0 : i32
    %c0_i32_0 = arith.constant 0 : i32
    %c0_i32_1 = arith.constant 0 : i32
    return %arg1, %c0_i32, %c0_i32_0 : i32, i32, i32
  }
  func.func @transform_15(%arg0: i32, %arg1: i32) -> (i32, i32, i32) {
    %c0_i32 = arith.constant 0 : i32
    %c0_i32_0 = arith.constant 0 : i32
    %c0_i32_1 = arith.constant 0 : i32
    return %arg1, %c0_i32, %c0_i32_0 : i32, i32, i32
  }
  func.func @transform_16(%arg0: i32, %arg1: i32) -> (i32, i32, i32) {
    %c0_i32 = arith.constant 0 : i32
    %c0_i32_0 = arith.constant 0 : i32
    %c0_i32_1 = arith.constant 0 : i32
    return %arg1, %c0_i32, %c0_i32_0 : i32, i32, i32
  }
  func.func @transform_17(%arg0: i32, %arg1: i32) -> (i32, i32, i32) {
    %c0_i32 = arith.constant 0 : i32
    %c0_i32_0 = arith.constant 0 : i32
    %c0_i32_1 = arith.constant 0 : i32
    return %arg1, %c0_i32, %c0_i32_0 : i32, i32, i32
  }
  func.func @transform_18(%arg0: i32, %arg1: i32) -> (i32, i32, i32) {
    %c0_i32 = arith.constant 0 : i32
    %c0_i32_0 = arith.constant 0 : i32
    %c0_i32_1 = arith.constant 0 : i32
    return %arg1, %c0_i32, %c0_i32_0 : i32, i32, i32
  }
  func.func @transform_19(%arg0: i32, %arg1: i32) -> (i32, i32, i32) {
    %c0_i32 = arith.constant 0 : i32
    %c0_i32_0 = arith.constant 0 : i32
    %c0_i32_1 = arith.constant 0 : i32
    return %arg0, %c0_i32, %c0_i32_0 : i32, i32, i32
  }
}

</mosaic_0001>

<bundles_post_ra>
// kernel: tpu_custom_call.1
= control target key start
LH: loop header
LB: loop body
LE: loop exit
PB: predicated region body
PF: predicated region fallthrough
CT: control target
= control target key end

     0   :  { %s3855_s0 = inlined_call_operand.vmem [shape: bf16[16,192], index: 0, kind: input, shape index: {}]   ;;  %s3856_s1 = inlined_call_operand.vmem [shape: bf16[192,32], index: 1, kind: input, shape index: {}]   ;;  %s3857_s2 = inlined_call_operand.vmem [shape: f32[16,32], index: 2, kind: input, shape index: {}]   ;;  %s3858_s3 = inlined_call_operand.vmem [shape: f32[2,1,32], index: 3, kind: input, shape index: {}]   ;;  %s3859_s4 = inlined_call_operand.vmem [shape: f32[2,1,32], index: 4, kind: input, shape index: {}]   ;;  %s3860_s5 = inlined_call_operand.vmem [shape: bf16[2,32,32], index: 5, kind: input, shape index: {}]   ;;  %s3861_s6 = inlined_call_operand.vmem [shape: f32[2,1,32], index: 6, kind: input, shape index: {}]   ;;  %s3862_s7 = inlined_call_operand.vmem [shape: bf16[2,32,32], index: 7, kind: input, shape index: {}]   ;;  %s3863_s8 = inlined_call_operand.vmem [shape: f32[2,1,32], index: 8, kind: input, shape index: {}]   ;;  %s3864_s9 = inlined_call_operand.vmem [shape: bf16[2,32,32], index: 9, kind: input, shape index: {}]   ;;  %s3865_s10 = inlined_call_operand.vmem [shape: f32[2,1,32], index: 10, kind: input, shape index: {}]   ;;  %s3866_s11 = inlined_call_operand.vmem [shape: bf16[2,32,32], index: 11, kind: input, shape index: {}]   ;;  %s3867_s12 = inlined_call_operand.vmem [shape: f32[2,1,32], index: 12, kind: input, shape index: {}]   ;;  %s3868_s13 = inlined_call_operand.vmem [shape: f32[2,1,32], index: 13, kind: input, shape index: {}]   ;;  %s3869_s14 = inlined_call_operand.vmem [shape: f32[2,1,32], index: 14, kind: input, shape index: {}]   ;;  %s3870_s15 = inlined_call_operand.vmem [shape: bf16[2,32,128], index: 15, kind: input, shape index: {}]   ;;  %s3871_s16 = inlined_call_operand.vmem [shape: f32[2,1,128], index: 16, kind: input, shape index: {}]   ;;  %s3872_s17 = inlined_call_operand.vmem [shape: bf16[2,128,32], index: 17, kind: input, shape index: {}]   ;;  %s3873_s18 = inlined_call_operand.vmem [shape: f32[2,1,32], index: 18, kind: input, shape index: {}]   ;;  %s3874_s19 = inlined_call_operand.hbm [shape: f32[2,4,32], index: 19, kind: output, shape index: {}]  }
   0x1   :  { %3882 = sst [smem:[#allocation11_spill]] %s3855_s0 }
   0x2   :  { %3883 = sst [smem:[#allocation12_spill]] %s3856_s1 }
   0x3   :  { %3884 = sst [smem:[#allocation13_spill]] %s3857_s2 }
   0x4   :  { %3885 = sst [smem:[#allocation14_spill]] %s3858_s3 }
   0x5   :  { %3886 = sst [smem:[#allocation15_spill]] %s3859_s4 }
   0x6   :  { %3887 = sst [smem:[#allocation16_spill]] %s3860_s5 }
   0x7   :  { %3888 = sst [smem:[#allocation17_spill]] %s3862_s7 }
   0x8   :  { %3889 = sst [smem:[#allocation18_spill]] %s3863_s8 }
   0x9   :  { %3890 = sst [smem:[#allocation19_spill]] %s3864_s9 }
   0xa   :  { %3891 = sst [smem:[#allocation20_spill]] %s3866_s11 }
   0xb   :  { %3892 = sst [smem:[#allocation21_spill]] %s3874_s19 }
   0xc   :  { %24 = vsyncpa [#allocation5], 0  ;;  %s3379_s0 = smov 0   ;;  %s3381_s30 = smov 0  }
   0xd   :  { %s3383_s20 = smov 0  }
   0xe LB: > { %3893 = sst [smem:[#allocation7_spill]] %s3256_s0  ;;  %s39_s1 = sadd.s32 1, %s3260_s30  ;;  %s3264_s20 = sphi %s3383_s20, %s30_s20   ;;  %s3260_s30 = sphi %s3381_s30, %s3924_s30   ;;  %s3256_s0 = sphi %s3379_s0, %s3923_s0  }
   0xf   : > { %3894 = sst [smem:[#allocation8_spill]] %s3260_s30  ;;  %p40_p0 = scmp.ge.s32.totalorder %s39_s1, 2 }
  0x10   : > { %3895 = sst [smem:[#allocation9_spill]] %s3264_s20  ;;  %p2791_p1 = scmp.ge.s32.totalorder %s3264_s20, 1 }
  0x11   : > { %p692_p2 = scmp.lt.s32.totalorder %s3264_s20, 3  ;;  %s3926_s1 = smov (%p40_p0, %s39_s1), 0 }
  0x12   : > { %3896 = sst [smem:[#allocation10_spill]] %s3926_s1 }
  0x13   : > { %p693_p3 = pnand %p2791_p1, %p692_p2 }
  0x14   : > { %p811_p4 = scmp.lt.s32.totalorder (!%p693_p3), %s3256_s0, 1  ;;  %s3899_s5 = sld [smem:[#allocation16_spill]] (!%p693_p3) }
  0x15   : > { %696 = sbr.rel (%p693_p3) target bundleno = 2970 (0xb9a), region = 96  ;;  %s3900_s7 = sld [smem:[#allocation17_spill]] (!%p693_p3) }
  0x16   : > { %s3902_s9 = sld [smem:[#allocation19_spill]] (!%p693_p3)  ;;  %s3903_s11 = sld [smem:[#allocation20_spill]] (!%p693_p3) }
  0x17   : > { %s3904_s26 = sld [smem:[#allocation7_spill]] (!%p693_p3) }
  0x1c   : > { %s3402_s22 = scalar_select %p811_p4, %s3256_s0, 1 }
  0x1d   : > { %p2804_p5 = scmp.ne.s32.totalorder %s3904_s26, 0 }
  0x1e   : > { %s2874_s28 = sshll.u32 %s3402_s22, 4  ;;  %s851_s3 = scalar_lea.vmem %s3868_s13, %s3402_s22  ;;  %v3266_v1 = vmov (!%p2804_p5), 0   ;;  %vm986_vm0 = vcmask (!%p2804_p5), 523264   ;;  %vm1031_vm1 = vcmask (!%p2804_p5), 261120  }
  0x1f   : > { %s3420_s30 = scalar_lea.vmem %s3899_s5, %s2874_s28  ;;  %s3425_s0 = scalar_lea.vmem %s3900_s7, %s2874_s28  ;;  %990 = vmatprep.subr.bf16.mxu0 (!%p2804_p5), %v3266_v1 }
  0x20   : > { %s3434_s4 = scalar_lea.vmem %s3902_s9, %s2874_s28  ;;  %s3443_s5 = scalar_lea.vmem %s3903_s11, %s2874_s28 }
  0x21   : > { %s854_s9 = scalar_lea.vmem %s3869_s14, %s3402_s22  ;;  %s3460_s29 = scalar_lea.vmem %s3870_s15, %s2874_s28 }
  0x22   : > { %s862_s1 = scalar_lea.vmem %s3871_s16, %s3402_s22  ;;  %s2879_s11 = sshll.u32 %s3402_s22, 6 }
  0x23   : > { %s3470_s7 = scalar_lea.vmem %s3872_s17, %s2879_s11  ;;  %s870_s27 = scalar_lea.vmem %s3873_s18, %s3402_s22 }
  0x24   : > { %876 = sbr.rel (%p2804_p5) target bundleno = 307 (0x133), region = 100  ;;  %s3905_s21 = sld [smem:[#allocation12_spill]] (!%p2804_p5) }
  0x25   : > { %s3906_s8 = sld [smem:[#allocation11_spill]] (!%p2804_p5)  ;;  %s3907_s23 = sld [smem:[#allocation13_spill]] (!%p2804_p5) }
  0x2a   : > { %v3135_v0 = vld [vmem:[%s3905_s21] sm:$0xff] (!%p2804_p5)   ;;  %v3136_v2 = vld [vmem:[%s3905_s21 + $0x8] sm:$0xff] (!%p2804_p5)   ;;  %v3137_v3 = vld [vmem:[%s3905_s21 + $0x10] sm:$0xff] (!%p2804_p5)  }
  0x2b   : > { %991 = vmatpush1.bf16.msra.mxu0 %v3135_v0  ;;  %v3138_v4 = vld [vmem:[%s3905_s21 + $0x18] sm:$0xff]   ;;  %v3149_v5 = vld [vmem:[%s3906_s8 + $0x4] ss:$8 sps:$4 sm:$0xff]   ;;  %v3141_v8 = vld [vmem:[%s3905_s21 + $0x30] sm:$0xff]  }
  0x2c   : > { %992 = vmatprep.subr.bf16.mxu0 %v3266_v1  ;;  %v3139_v6 = vld [vmem:[%s3905_s21 + $0x20] sm:$0xff]   ;;  %2819 = vmatprep.mubr.msk.bf16.mxu0 %vm986_vm0, %v3149_v5  ;;  %v3140_v7 = vld [vmem:[%s3905_s21 + $0x28] sm:$0xff]   ;;  %v3142_v9 = vld [vmem:[%s3905_s21 + $0x38] sm:$0xff]  }
  0x2d   : > { %v3143_v10 = vld [vmem:[%s3905_s21 + $0x40] sm:$0xff]   ;;  %v3144_v11 = vld [vmem:[%s3905_s21 + $0x48] sm:$0xff]   ;;  %v3145_v12 = vld [vmem:[%s3905_s21 + $0x50] sm:$0xff]  }
  0x2e   : > { %v3146_v13 = vld [vmem:[%s3905_s21 + $0x58] sm:$0xff]   ;;  %v3147_v14 = vld [vmem:[%s3906_s8] ss:$8 sps:$4 sm:$0xff]  }
  0x2f   : > { %993 = vmatpush1.bf16.msra.mxu0 %v3136_v2  ;;  %v903_v15 = vld [vmem:[%s3907_s23] sm:$0xff]  ;;  %v904_v17 = vld [vmem:[%s3907_s23 + $0x8] sm:$0xff] }
  0x30   : > { %994 = vmatprep.subr.bf16.mxu0 %v3266_v1 }
  0x33   : > { %995 = vmatpush1.bf16.msra.mxu0 %v3137_v3 }
  0x34   : > { %996 = vmatprep.subr.bf16.mxu0 %v3266_v1 }
  0x37   : > { %997 = vmatpush1.bf16.msra.mxu0 %v3138_v4 }
  0x38   : > { %998 = vmatprep.subr.bf16.mxu0 %v3266_v1 }
  0x3b   : > { %999 = vmatpush1.bf16.msra.mxu0 %v3139_v6 }
  0x3c   : > { %1000 = vmatprep.subr.bf16.mxu0 %v3266_v1 }
  0x3f   : > { %1001 = vmatpush1.bf16.msra.mxu0 %v3140_v7 }
  0x40   : > { %1002 = vmatprep.subr.bf16.mxu0 %v3266_v1 }
  0x43   : > { %1003 = vmatpush1.bf16.msra.mxu0 %v3141_v8 }
  0x44   : > { %1004 = vmatprep.subr.bf16.mxu0 %v3266_v1 }
  0x47   : > { %1005 = vmatpush1.bf16.msra.mxu0 %v3142_v9 }
  0x48   : > { %1006 = vmatprep.subr.bf16.mxu0 %v3266_v1 }
  0x4b   : > { %1007 = vmatpush1.bf16.msra.mxu0 %v3143_v10 }
  0x4c   : > { %1008 = vmatprep.subr.bf16.mxu0 %v3266_v1 }
  0x4f   : > { %1009 = vmatpush1.bf16.msra.mxu0 %v3144_v11 }
  0x50   : > { %1010 = vmatprep.subr.bf16.mxu0 %v3266_v1 }
  0x53   : > { %1011 = vmatpush1.bf16.msra.mxu0 %v3145_v12 }
  0x54   : > { %1012 = vmatprep.subr.bf16.mxu0 %v3266_v1 }
  0x57   : > { %1013 = vmatpush1.bf16.msra.mxu0 %v3146_v13 }
  0x5a   : > { %1023 = vmatmul.mubr.bf16.vlgmr.msra.gmra.mrb[0].mxu0 %v3147_v14 }
 0x12d   : > { %v1024_v16 = vpop.f32.mrb[0].mxu0 }
 0x12e   : > { %v1025_v18 = vadd.f32 %v1024_v16, %v903_v15  ;;  %v1026_v19 = vpop.f32.mrb[1].mxu0 }
 0x12f   : > { %v1027_v20 = vpop.f32.mrb[2].mxu0 }
 0x130   : > { %1032 = vst.msk [vmem:[#allocation2] sm:$0xff] %vm1031_vm1, %v1025_v18  ;;  %v1028_v21 = vadd.f32 %v1027_v20, %v904_v17  ;;  %v1029_v22 = vpop.f32.mrb[3].mxu0 }
 0x132   : > { %1033 = vst.msk [vmem:[#allocation2 + $0x8] sm:$0xff] %vm1031_vm1, %v1028_v21 }
 0x133 PF: > { %vm1042_vm2 = vcmask 261120   ;;  %v3150_v37 = vld [vmem:[%s3420_s30] sm:$0xff]   ;;  %v3267_v38 = vmov 0.0   ;;  %v3151_v39 = vld [vmem:[%s3420_s30 + $0x8] sm:$0xff]   ;;  %vm3268_vm3 = vmmov 0   ;;  %s3908_s25 = sld [smem:[#allocation14_spill]]  ;;  %s3912_s30 = scalar_lea.vmem %s3861_s6, %s3402_s22 }
 0x134   : > { %2936 = vmatprep.subr.bf16.mxu0 %v3267_v38  ;;  %2960 = vmatprep.subr.bf16.mxu1 %v3267_v38  ;;  %s3910_s2 = sld [smem:[#allocation15_spill]]  ;;  %v3152_v56 = vld [vmem:[%s3425_s0] sm:$0xff]   ;;  %v3153_v58 = vld [vmem:[%s3425_s0 + $0x8] sm:$0xff]   ;;  %vm1285_vm4 = vcmask 64512   ;;  %s3270_s0 = smov 112   ;;  %vm1349_vm5 = vcmask 1043456  }
 0x135   : > { %2937 = vmatpush3.bf16.msra.mxu0 %v3150_v37  ;;  %2940 = vmatprep.mubr.msk.bf16.mxu0 %vm3268_vm3, %v3267_v38  ;;  %v3154_v59 = vld [vmem:[%s3434_s4] sm:$0xff]   ;;  %v3155_v60 = vld [vmem:[%s3434_s4 + $0x8] sm:$0xff]   ;;  %s3269_s4 = smov 120   ;;  %s3271_s19 = smov 104   ;;  %vm1394_vm7 = vcmask 60416   ;;  %vm1512_vm8 = vcmask 64516  }
 0x136   : > { %2938 = vmatprep.subr.bf16.mxu0 %v3267_v38  ;;  %2962 = vmatprep.mubr.msk.bf16.mxu1 %vm3268_vm3, %v3267_v38  ;;  %v2822_v61 = vld [vmem:[%s3912_s30] ss:$0 sm:$0xff]  ;;  %s3273_s30 = smov 8   ;;  %s3275_s20 = smov 24   ;;  %vm1631_vm9 = vcmask 126016   ;;  %vm1751_vm10 = vcmask 130116  }
 0x137   : > { %v3525_v23 = vld [vmem:[#allocation2] sm:$0xff]  ;;  %vm1870_vm11 = vcmask 191616   ;;  %vm1990_vm12 = vcmask 195716   ;;  %vm2109_vm13 = vcmask 257216   ;;  %vm2229_vm14 = vcmask 261316  }
 0x138   : > { %v1043_v25 = vsel %vm1042_vm2, %v3525_v23, 0.0 }
 0x139   : > { %v3527_v24 = vld [vmem:[#allocation2 + $0x8] sm:$0xff]  ;;  %1044 = vadd.xlane.f32.xlu0 %v1043_v25  ;;  %2939 = vmatpush3.bf16.msra.mxu0 %v3151_v39  ;;  %s3909_s24 = scalar_lea.vmem %s3908_s25, %s3402_s22 }
 0x13a   : > { %v1046_v26 = vsel %vm1042_vm2, %v3527_v24, 0.0  ;;  %2944 = vmatprep.subr.bf16.mxu0 %v3267_v38  ;;  %v2820_v48 = vld [vmem:[%s3909_s24] ss:$0 sm:$0xff]  ;;  %s3911_s11 = scalar_lea.vmem %s3910_s2, %s3402_s22  ;;  %s3913_s24 = sld [smem:[#allocation18_spill]] }
 0x13b   : > { %v2821_v52 = vld [vmem:[%s3911_s11] ss:$0 sm:$0xff]  ;;  %s3915_s11 = scalar_lea.vmem %s3865_s10, %s3402_s22 }
 0x13c   : > { %v2830_v15 = vld [vmem:[%s3915_s11] ss:$0 sm:$0xff]  ;;  %s3917_s11 = sld [smem:[#allocation7_spill]] }
 0x13d   : > { %1047 = vadd.xlane.f32.xlu0 %v1046_v26 }
 0x140   : > { %s3914_s26 = scalar_lea.vmem %s3913_s24, %s3402_s22  ;;  %s3916_s24 = scalar_lea.vmem %s3867_s12, %s3402_s22 }
 0x141   : > { %v2826_v5 = vld [vmem:[%s3914_s26] ss:$0 sm:$0xff] }
 0x142   : > { %p2869_p6 = scmp.ne.s32.totalorder %s3917_s11, 1 }
 0x143   : > { %vm2556_vm15 = vcmask (!%p2869_p6), 257024  }
 0x1c6   : > { %v1045_v27 = vpop.xlane.xlu0 %1044 }
 0x1c7   : > { %v1050_v28 = vmul.f32 0.03125, %v1045_v27 }
 0x1c9   : > { %v1052_v29 = vsub.f32 %v3525_v23, %v1050_v28 }
 0x1ca   : > { %v1048_v30 = vpop.xlane.xlu0 %1047 }
 0x1cb   : > { %v1051_v31 = vmul.f32 0.03125, %v1048_v30  ;;  %v1054_v32 = vmul.f32 %v1052_v29, %v1052_v29 }
 0x1cd   : > { %v1053_v33 = vsub.f32 %v3527_v24, %v1051_v31  ;;  %v1056_v34 = vsel %vm1042_vm2, %v1054_v32, 0.0 }
 0x1ce   : > { %1057 = vadd.xlane.f32.xlu1 %v1056_v34 }
 0x1cf   : > { %v1055_v35 = vmul.f32 %v1053_v33, %v1053_v33 }
 0x1d1   : > { %v1059_v36 = vsel %vm1042_vm2, %v1055_v35, 0.0 }
 0x1d2   : > { %1060 = vadd.xlane.f32.xlu1 %v1059_v36 }
 0x25b   : > { %v1058_v40 = vpop.xlane.xlu1 %1057 }
 0x25c   : > { %v1062_v41 = vmul.f32 0.03125, %v1058_v40 }
 0x25e   : > { %v1064_v42 = vadd.f32 1e-06, %v1062_v41 }
 0x25f   : > { %v1061_v43 = vpop.xlane.xlu1 %1060 }
 0x260   : > { %3168 = vrsqrt.f32 %v1064_v42  ;;  %v1063_v44 = vmul.f32 0.03125, %v1061_v43 }
 0x262   : > { %v1065_v45 = vadd.f32 1e-06, %v1063_v44 }
 0x264   : > { %3170 = vrsqrt.f32 %v1065_v45 }
 0x26a   : > { %v3169_v46 = vpop.eup %3168 }
 0x26b   : > { %v1068_v47 = vmul.f32 %v3169_v46, %v1052_v29 }
 0x26d   : > { %v1076_v51 = vmul.f32 %v2820_v48, %v1068_v47  ;;  %v1036_v47 = vlaneseq }
 0x26e   : > { %v3171_v49 = vpop.eup %3170 }
 0x26f   : > { %v1069_v50 = vmul.f32 %v3171_v49, %v1053_v33  ;;  %v1084_v54 = vadd.f32 %v2821_v52, %v1076_v51 }
 0x271   : > { %v1077_v53 = vmul.f32 %v2820_v48, %v1069_v50  ;;  %v1037_v48 = vand.u32 127, %v1036_v47  ;;  %v3272_v50 = vmov -1e+30  }
 0x273   : > { %v1085_v55 = vadd.f32 %v2821_v52, %v1077_v53  ;;  %vm1038_vm6 = vcmp.lt.s32.totalorder %v1037_v48, 5 }
 0x274   : > { %v3646_v51 = vsel %vm1038_vm6, 0.0, %v3272_v50 }
 0x275   : > { %v1086_v57 = vpack.c.bf16 %v1085_v55, %v1084_v54 }
 0x277   : > { %2941 = vmatmul.mubr.msk.bf16.vlgmr.msra.gmra.mrb[0].mxu0 %vm1042_vm2, %v1086_v57 }
 0x278   : > { %2945 = vmatpush3.bf16.msra.mxu0 %v3152_v56  ;;  %2948 = vmatprep.mubr.msk.bf16.mxu0 %vm3268_vm3, %v3267_v38 }
 0x279   : > { %2946 = vmatprep.subr.bf16.mxu0 %v3267_v38 }
 0x27c   : > { %2947 = vmatpush3.bf16.msra.mxu0 %v3153_v58 }
 0x27d   : > { %2952 = vmatprep.subr.bf16.mxu0 %v3267_v38 }
 0x27f   : > { %2949 = vmatmul.mubr.msk.bf16.vlgmr.msra.gmra.mrb[4].mxu0 %vm1042_vm2, %v1086_v57 }
 0x280   : > { %2953 = vmatpush3.bf16.msra.mxu0 %v3154_v59  ;;  %2956 = vmatprep.mubr.msk.bf16.mxu0 %vm3268_vm3, %v3267_v38 }
 0x281   : > { %2954 = vmatprep.subr.bf16.mxu0 %v3267_v38 }
 0x284   : > { %2955 = vmatpush3.bf16.msra.mxu0 %v3155_v60 }
 0x285   : > { %2966 = vmatprep.subr.bf16.mxu0 %v3267_v38 }
 0x287   : > { %2957 = vmatmul.mubr.msk.bf16.vlgmr.msra.gmra.mrb[8].mxu0 %vm1042_vm2, %v1086_v57 }
 0x288   : > { %2968 = vmatprep.mubr.msk.bf16.mxu0 %vm3268_vm3, %v3267_v38 }
 0x34a   : > { %v1147_v62 = vpop.f32.mrb[0].mxu0 }
 0x34b   : > { %v2942_v63 = vpop.f32.mrb[1].mxu0  ;;  %v1148_v1 = vadd.f32 %v2822_v61, %v1147_v62 }
 0x34c   : > { %v1150_v0 = vpop.f32.mrb[2].mxu0 }
 0x34d   : > { %v1151_v2 = vadd.f32 %v2822_v61, %v1150_v0  ;;  %v2943_v3 = vpop.f32.mrb[3].mxu0 }
 0x34f   : > { %v1282_v4 = vpack.c.bf16 %v1151_v2, %v1148_v1 }
 0x351   : > { %1514 = vrot.lane.b32.xlu1 %v1282_v4, %s3269_s4  ;;  %v1397_v22 = vrot.slane %v1282_v4, 4 }
 0x352   : > { %v1211_v6 = vpop.f32.mrb[4].mxu0 }
 0x353   : > { %v2950_v7 = vpop.f32.mrb[5].mxu0  ;;  %v1212_v9 = vadd.f32 %v2826_v5, %v1211_v6 }
 0x354   : > { %v1214_v8 = vpop.f32.mrb[6].mxu0 }
 0x355   : > { %v1215_v10 = vadd.f32 %v2826_v5, %v1214_v8  ;;  %v2951_v11 = vpop.f32.mrb[7].mxu0 }
 0x357   : > { %v1283_v12 = vpack.c.bf16 %v1215_v10, %v1212_v9 }
 0x359   : > { %1516 = vrot.lane.b32.xlu0 %v1283_v12, %s3269_s4  ;;  %v1290_v13 = vsel %vm1285_vm4, %v1283_v12, 0  ;;  %v1399_v14 = vrot.slane %v1283_v12, 4 }
 0x35a   : > { %v1275_v16 = vpop.f32.mrb[8].mxu0  ;;  %2961 = vmatpush3.bf16.xpose.msra.mxu1 %v1290_v13 }
 0x35b   : > { %1635 = vrot.lane.b32.xlu1 %v1399_v14, %s3269_s4  ;;  %v2958_v17 = vpop.f32.mrb[9].mxu0  ;;  %2972 = vmatprep.subr.bf16.mxu1 %v3267_v38  ;;  %v1276_v19 = vadd.f32 %v2830_v15, %v1275_v16  ;;  %v1404_v27 = vsel %vm1285_vm4, %v1399_v14, 0 }
 0x35c   : > { %v1278_v18 = vpop.f32.mrb[10].mxu0 }
 0x35d   : > { %v1279_v20 = vadd.f32 %v2830_v15, %v1278_v18  ;;  %1755 = vrot.lane.b32.xlu0 %v1283_v12, %s3270_s0  ;;  %v2959_v21 = vpop.f32.mrb[11].mxu0 }
 0x35f   : > { %v3595_v25 = vpack.c.bf16 %v1279_v20, %v1276_v19  ;;  %1633 = vrot.lane.b32.xlu1 %v1397_v22, %s3269_s4 }
 0x361   : > { %1874 = vrot.lane.b32.xlu0 %v1399_v14, %s3270_s0  ;;  %2963 = vmatmul.mubr.msk.bf16.vlgmr.msra.gmra.mrb[0].mxu1 %vm1285_vm4, %v1282_v4  ;;  %v1351_v26 = vsel %vm1349_vm5, %v3595_v25, 0 }
 0x362   : > { %2967 = vmatpush3.bf16.msra.mxu0 %v1351_v26  ;;  %2973 = vmatpush3.bf16.xpose.msra.mxu1 %v1404_v27 }
 0x363   : > { %1753 = vrot.lane.b32.xlu1 %v1282_v4, %s3270_s0  ;;  %2974 = vmatprep.mubr.msk.bf16.mxu1 %vm3268_vm3, %v3267_v38 }
 0x364   : > { %2984 = vmatprep.subr.bf16.mxu1 %v3267_v38  ;;  %2978 = vmatprep.subr.bf16.mxu0 %v3267_v38 }
 0x365   : > { %1994 = vrot.lane.b32.xlu0 %v1283_v12, %s3271_s19 }
 0x367   : > { %1872 = vrot.lane.b32.xlu1 %v1397_v22, %s3270_s0 }
 0x369   : > { %2113 = vrot.lane.b32.xlu0 %v1399_v14, %s3271_s19  ;;  %2975 = vmatmul.mubr.msk.bf16.vlgmr.msra.gmra.mrb[4].mxu1 %vm1285_vm4, %v1397_v22 }
 0x36a   : > { %2986 = vmatprep.mubr.msk.bf16.mxu1 %vm3268_vm3, %v3267_v38 }
 0x36b   : > { %1992 = vrot.lane.b32.xlu1 %v1282_v4, %s3271_s19 }
 0x36f   : > { %2111 = vrot.lane.b32.xlu1 %v1397_v22, %s3271_s19 }
 0x3c3   : > { %v1515_v30 = vpop.permute.xlu1 %1514 }
 0x3cb   : > { %v1517_v28 = vpop.permute.xlu0 %1516 }
 0x3cc   : > { %v1522_v29 = vsel %vm1285_vm4, %v1517_v28, 0 }
 0x3cd   : > { %2985 = vmatpush3.bf16.xpose.msra.mxu1 %v1522_v29  ;;  %v1636_v31 = vpop.permute.xlu1 %1635 }
 0x3ce   : > { %2996 = vmatprep.subr.bf16.mxu1 %v3267_v38  ;;  %v1641_v32 = vsel %vm1285_vm4, %v1636_v31, 0 }
 0x3cf   : > { %v1756_v33 = vpop.permute.xlu0 %1755 }
 0x3d0   : > { %v1761_v35 = vsel %vm1285_vm4, %v1756_v33, 0 }
 0x3d1   : > { %v1634_v34 = vpop.permute.xlu1 %1633 }
 0x3d3   : > { %v1875_v36 = vpop.permute.xlu0 %1874 }
 0x3d4   : > { %2987 = vmatmul.mubr.msk.bf16.vlgmr.msra.gmra.mrb[8].mxu1 %vm1285_vm4, %v1515_v30  ;;  %v1880_v39 = vsel %vm1285_vm4, %v1875_v36, 0 }
 0x3d5   : > { %2997 = vmatpush3.bf16.xpose.msra.mxu1 %v1641_v32  ;;  %2998 = vmatprep.mubr.msk.bf16.mxu1 %vm3268_vm3, %v3267_v38  ;;  %v1754_v37 = vpop.permute.xlu1 %1753 }
 0x3d6   : > { %3008 = vmatprep.subr.bf16.mxu1 %v3267_v38 }
 0x3d7   : > { %v1995_v40 = vpop.permute.xlu0 %1994 }
 0x3d8   : > { %v2000_v42 = vsel %vm1285_vm4, %v1995_v40, 0 }
 0x3d9   : > { %v1873_v41 = vpop.permute.xlu1 %1872 }
 0x3db   : > { %v2114_v43 = vpop.permute.xlu0 %2113 }
 0x3dc   : > { %2999 = vmatmul.mubr.msk.bf16.vlgmr.msra.gmra.mrb[12].mxu1 %vm1285_vm4, %v1634_v34  ;;  %v2119_v45 = vsel %vm1285_vm4, %v2114_v43, 0 }
 0x3dd   : > { %3009 = vmatpush3.bf16.xpose.msra.mxu1 %v1761_v35  ;;  %3010 = vmatprep.mubr.msk.bf16.mxu1 %vm3268_vm3, %v3267_v38  ;;  %v1993_v44 = vpop.permute.xlu1 %1992 }
 0x3de   : > { %3020 = vmatprep.subr.bf16.mxu1 %v3267_v38 }
 0x3e1   : > { %v2112_v46 = vpop.permute.xlu1 %2111 }
 0x3e4   : > { %3011 = vmatmul.mubr.msk.bf16.vlgmr.msra.gmra.mrb[16].mxu1 %vm1285_vm4, %v1754_v37 }
 0x3e5   : > { %3021 = vmatpush3.bf16.xpose.msra.mxu1 %v1880_v39  ;;  %3022 = vmatprep.mubr.msk.bf16.mxu1 %vm3268_vm3, %v3267_v38 }
 0x3e6   : > { %3032 = vmatprep.subr.bf16.mxu1 %v3267_v38 }
 0x3ec   : > { %3023 = vmatmul.mubr.msk.bf16.vlgmr.msra.gmra.mrb[20].mxu1 %vm1285_vm4, %v1873_v41 }
 0x3ed   : > { %3033 = vmatpush3.bf16.xpose.msra.mxu1 %v2000_v42  ;;  %3034 = vmatprep.mubr.msk.bf16.mxu1 %vm3268_vm3, %v3267_v38 }
 0x3ee   : > { %3044 = vmatprep.subr.bf16.mxu1 %v3267_v38 }
 0x3f4   : > { %3035 = vmatmul.mubr.msk.bf16.vlgmr.msra.gmra.mrb[24].mxu1 %vm1285_vm4, %v1993_v44 }
 0x3f5   : > { %3045 = vmatpush3.bf16.xpose.msra.mxu1 %v2119_v45  ;;  %3046 = vmatprep.mubr.msk.bf16.mxu1 %vm3268_vm3, %v3267_v38 }
 0x3f6   : > { %3056 = vmatprep.subr.bf16.mxu1 %v3267_v38 }
 0x3fc   : > { %3047 = vmatmul.mubr.msk.bf16.vlgmr.msra.gmra.mrb[28].mxu1 %vm1285_vm4, %v2112_v46 }
 0x3fd   : > { %3060 = vmatprep.mubr.msk.bf16.mxu1 %vm3268_vm3, %v3267_v38 }
 0x434   : > { %v1326_v49 = vpop.f32.mrb[0].mxu1 }
 0x435   : > { %v1332_v52 = vmul.f32 0.35355338, %v1326_v49  ;;  %v2964_v53 = vpop.f32.mrb[1].mxu1 }
 0x436   : > { %v1329_v54 = vpop.f32.mrb[2].mxu1 }
 0x437   : > { %v2965_v55 = vpop.f32.mrb[3].mxu1  ;;  %v1333_v56 = vadd.f32 %v1332_v52, %v3646_v51 }
 0x439   : > { %v1334_v57 = vsel %vm1285_vm4, %v1333_v56, -inf }
 0x43a   : > { %1335 = vmax.xlane.f32.xlu0 %v1334_v57 }
 0x43c   : > { %v1440_v58 = vpop.f32.mrb[4].mxu1 }
 0x43d   : > { %v1446_v59 = vmul.f32 0.35355338, %v1440_v58  ;;  %v2976_v60 = vpop.f32.mrb[5].mxu1 }
 0x43e   : > { %v1443_v61 = vpop.f32.mrb[6].mxu1 }
 0x43f   : > { %v2977_v62 = vpop.f32.mrb[7].mxu1  ;;  %v1447_v63 = vadd.f32 %v1446_v59, %v3646_v51 }
 0x441   : > { %v1448_v0 = vsel %vm1285_vm4, %v1447_v63, -inf }
 0x442   : > { %1449 = vmax.xlane.f32.xlu1 %v1448_v0 }
 0x4a7   : > { %v1558_v1 = vpop.f32.mrb[8].mxu1 }
 0x4a8   : > { %v1564_v2 = vmul.f32 0.35355338, %v1558_v1  ;;  %v2988_v3 = vpop.f32.mrb[9].mxu1 }
 0x4a9   : > { %v1561_v4 = vpop.f32.mrb[10].mxu1 }
 0x4aa   : > { %v2989_v5 = vpop.f32.mrb[11].mxu1  ;;  %v1565_v6 = vadd.f32 %v1564_v2, %v3646_v51 }
 0x4ac   : > { %v1566_v7 = vsel %vm1285_vm4, %v1565_v6, -inf }
 0x4ad   : > { %1567 = vmax.xlane.f32.xlu0 %v1566_v7 }
 0x4af   : > { %v1677_v8 = vpop.f32.mrb[12].mxu1 }
 0x4b0   : > { %v1683_v9 = vmul.f32 0.35355338, %v1677_v8  ;;  %v3000_v10 = vpop.f32.mrb[13].mxu1 }
 0x4b1   : > { %v1680_v11 = vpop.f32.mrb[14].mxu1 }
 0x4b2   : > { %v3001_v12 = vpop.f32.mrb[15].mxu1  ;;  %v1684_v13 = vadd.f32 %v1683_v9, %v3646_v51 }
 0x4b4   : > { %v1685_v14 = vsel %vm1285_vm4, %v1684_v13, -inf }
 0x4b5   : > { %1686 = vmax.xlane.f32.xlu0 %v1685_v14 }
 0x4b7   : > { %v1797_v15 = vpop.f32.mrb[16].mxu1 }
 0x4b8   : > { %v1803_v16 = vmul.f32 0.35355338, %v1797_v15  ;;  %v3012_v17 = vpop.f32.mrb[17].mxu1 }
 0x4b9   : > { %v1800_v18 = vpop.f32.mrb[18].mxu1 }
 0x4ba   : > { %v3013_v19 = vpop.f32.mrb[19].mxu1  ;;  %v3657_v20 = vadd.f32 %v1803_v16, %v3646_v51 }
 0x4bc   : > { %v1805_v21 = vsel %vm1285_vm4, %v3657_v20, -inf }
 0x4bd   : > { %1806 = vmax.xlane.f32.xlu0 %v1805_v21 }
 0x4bf   : > { %v1916_v22 = vpop.f32.mrb[20].mxu1 }
 0x4c0   : > { %v1922_v26 = vmul.f32 0.35355338, %v1916_v22  ;;  %v3024_v27 = vpop.f32.mrb[21].mxu1  ;;  %v1461_v22 = vrot.slane %v3595_v25, 4 }
 0x4c1   : > { %v1919_v28 = vpop.f32.mrb[22].mxu1 }
 0x4c2   : > { %v3025_v29 = vpop.f32.mrb[23].mxu1  ;;  %v1923_v30 = vadd.f32 %v1922_v26, %v3646_v51  ;;  %v1466_v27 = vsel %vm1349_vm5, %v1461_v22, 0 }
 0x4c4   : > { %v1924_v31 = vsel %vm1285_vm4, %v1923_v30, -inf }
 0x4c5   : > { %1925 = vmax.xlane.f32.xlu1 %v1924_v31 }
 0x4c7   : > { %v1336_v32 = vpop.xlane.xlu0 %1335  ;;  %v2036_v33 = vpop.f32.mrb[24].mxu1 }
 0x4c8   : > { %v1337_v34 = vsub.f32 %v1333_v56, %v1336_v32  ;;  %v2042_v35 = vmul.f32 0.35355338, %v2036_v33  ;;  %v3036_v36 = vpop.f32.mrb[25].mxu1 }
 0x4c9   : > { %v2039_v37 = vpop.f32.mrb[26].mxu1 }
 0x4ca   : > { %v1338_v39 = vmul.f32 1.442695, %v1337_v34  ;;  %v3037_v40 = vpop.f32.mrb[27].mxu1  ;;  %v2043_v41 = vadd.f32 %v2042_v35, %v3646_v51 }
 0x4cc   : > { %3172 = vpow2.f32 %v1338_v39  ;;  %v2044_v42 = vsel %vm1285_vm4, %v2043_v41, -inf }
 0x4cd   : > { %2045 = vmax.xlane.f32.xlu0 %v2044_v42 }
 0x4cf   : > { %v1450_v43 = vpop.xlane.xlu1 %1449  ;;  %v2155_v44 = vpop.f32.mrb[28].mxu1 }
 0x4d0   : > { %v1451_v45 = vsub.f32 %v1447_v63, %v1450_v43  ;;  %v2161_v46 = vmul.f32 0.35355338, %v2155_v44  ;;  %v3048_v47 = vpop.f32.mrb[29].mxu1 }
 0x4d1   : > { %v2158_v48 = vpop.f32.mrb[30].mxu1 }
 0x4d2   : > { %v1452_v49 = vmul.f32 1.442695, %v1451_v45  ;;  %v3049_v50 = vpop.f32.mrb[31].mxu1  ;;  %v3666_v52 = vadd.f32 %v2161_v46, %v3646_v51 }
 0x4d4   : > { %3174 = vpow2.f32 %v1452_v49  ;;  %v2163_v53 = vsel %vm1285_vm4, %v3666_v52, -inf }
 0x4d5   : > { %2164 = vmax.xlane.f32.xlu1 %v2163_v53 }
 0x4d6   : > { %v3173_v54 = vpop.eup %3172 }
 0x4d7   : > { %v1340_v55 = vsel %vm1285_vm4, %v3173_v54, 0.0 }
 0x4d8   : > { %1341 = vadd.xlane.f32.xlu0 %v1340_v55 }
 0x4de   : > { %v3175_v56 = vpop.eup %3174 }
 0x4df   : > { %v1454_v57 = vsel %vm1285_vm4, %v3175_v56, 0.0 }
 0x4e0   : > { %1455 = vadd.xlane.f32.xlu1 %v1454_v57 }
 0x53a   : > { %v1568_v58 = vpop.xlane.xlu0 %1567 }
 0x53b   : > { %v1569_v59 = vsub.f32 %v1565_v6, %v1568_v58 }
 0x53d   : > { %v1570_v60 = vmul.f32 1.442695, %v1569_v59 }
 0x53f   : > { %3176 = vpow2.f32 %v1570_v60 }
 0x542   : > { %v1687_v61 = vpop.xlane.xlu0 %1686 }
 0x543   : > { %v1688_v51 = vsub.f32 %v1684_v13, %v1687_v61 }
 0x545   : > { %v1689_v62 = vmul.f32 1.442695, %v1688_v51 }
 0x547   : > { %3178 = vpow2.f32 %v1689_v62 }
 0x549   : > { %v3672_v63 = vpop.eup %3176 }
 0x54a   : > { %v1572_v0 = vsel %vm1285_vm4, %v3672_v63, 0.0  ;;  %v1807_v6 = vpop.xlane.xlu0 %1806 }
 0x54b   : > { %1573 = vadd.xlane.f32.xlu0 %v1572_v0  ;;  %v1808_v15 = vsub.f32 %v3657_v20, %v1807_v6 }
 0x54d   : > { %v1809_v18 = vmul.f32 1.442695, %v1808_v15 }
 0x551   : > { %v3676_v1 = vpop.eup %3178 }
 0x552   : > { %v1926_v2 = vpop.xlane.xlu1 %1925  ;;  %v1691_v3 = vsel %vm1285_vm4, %v3676_v1, 0.0 }
 0x553   : > { %v1927_v4 = vsub.f32 %v1923_v30, %v1926_v2  ;;  %1692 = vadd.xlane.f32.xlu1 %v1691_v3 }
 0x555   : > { %v1928_v5 = vmul.f32 1.442695, %v1927_v4 }
 0x557   : > { %3180 = vpow2.f32 %v1928_v5 }
 0x55a   : > { %v2046_v7 = vpop.xlane.xlu0 %2045 }
 0x55b   : > { %v2047_v8 = vsub.f32 %v2043_v41, %v2046_v7 }
 0x55d   : > { %v2048_v9 = vmul.f32 1.442695, %v2047_v8 }
 0x55f   : > { %3182 = vpow2.f32 %v2048_v9 }
 0x561   : > { %v3680_v10 = vpop.eup %3180  ;;  %1578 = vrot.lane.b32.xlu0 %v3595_v25, %s3269_s4 }
 0x562   : > { %v1930_v11 = vsel %vm1285_vm4, %v3680_v10, 0.0  ;;  %v2165_v14 = vpop.xlane.xlu1 %2164 }
 0x563   : > { %1931 = vadd.xlane.f32.xlu1 %v1930_v11  ;;  %v2166_v32 = vsub.f32 %v3666_v52, %v2165_v14 }
 0x565   : > { %v1342_v12 = vpop.xlane.xlu0 %1341  ;;  %v2167_v33 = vmul.f32 1.442695, %v2166_v32 }
 0x566   : > { %3184 = vrcp.f32 %v1342_v12 }
 0x569   : > { %v3686_v13 = vpop.eup %3182 }
 0x56a   : > { %v2050_v16 = vsel %vm1285_vm4, %v3686_v13, 0.0 }
 0x56b   : > { %2051 = vadd.xlane.f32.xlu1 %v2050_v16 }
 0x56d   : > { %v1456_v17 = vpop.xlane.xlu1 %1455 }
 0x56e   : > { %3186 = vrcp.f32 %v1456_v17 }
 0x56f   : > { %3188 = vpow2.f32 %v1809_v18 }
 0x570   : > { %v3185_v19 = vpop.eup %3184  ;;  %3190 = vpow2.f32 %v2167_v33 }
 0x571   : > { %v1344_v21 = vmul.f32 %v3185_v19, %v3173_v54 }
 0x573   : > { %v1345_v26 = vpack.c.bf16 %v1344_v21, %v1344_v21 }
 0x575   : > { %2969 = vmatmul.mubr.msk.bf16.vlgmr.msra.gmra.mrb[12].mxu0 %vm1285_vm4, %v1345_v26 }
 0x576   : > { %2979 = vmatpush3.bf16.msra.mxu0 %v1466_v27  ;;  %2980 = vmatprep.mubr.msk.bf16.mxu0 %vm3268_vm3, %v3267_v38 }
 0x577   : > { %2990 = vmatprep.subr.bf16.mxu0 %v3267_v38 }
 0x578   : > { %v3187_v20 = vpop.eup %3186 }
 0x579   : > { %v1458_v28 = vmul.f32 %v3187_v20, %v3175_v56  ;;  %v3189_v30 = vpop.eup %3188 }
 0x57a   : > { %v1811_v31 = vsel %vm1285_vm4, %v3189_v30, 0.0  ;;  %v3706_v34 = vpop.eup %3190 }
 0x57b   : > { %v1459_v29 = vpack.c.bf16 %v1458_v28, %v1458_v28  ;;  %v2169_v35 = vsel %vm1285_vm4, %v3706_v34, 0.0 }
 0x57c   : > { %1697 = vrot.lane.b32.xlu1 %v1461_v22, %s3269_s4  ;;  %s3274_s4 = smov 16  }
 0x57d   : > { %2981 = vmatmul.mubr.msk.bf16.vlgmr.msra.gmra.mrb[16].mxu0 %vm1285_vm4, %v1459_v29 }
 0x57e   : > { %2992 = vmatprep.mubr.msk.bf16.mxu0 %vm3268_vm3, %v3267_v38 }
 0x580   : > { %1812 = vadd.xlane.f32.xlu0 %v1811_v31 }
 0x596   : > { %1817 = vrot.lane.b32.xlu0 %v3595_v25, %s3270_s0 }
 0x59a   : > { %1936 = vrot.lane.b32.xlu0 %v1461_v22, %s3270_s0 }
 0x59e   : > { %2056 = vrot.lane.b32.xlu0 %v3595_v25, %s3271_s19 }
 0x5a0   : > { %2170 = vadd.xlane.f32.xlu1 %v2169_v35 }
 0x5a2   : > { %2175 = vrot.lane.b32.xlu0 %v1461_v22, %s3271_s19 }
 0x5d8   : > { %v1574_v36 = vpop.xlane.xlu0 %1573 }
 0x5d9   : > { %3192 = vrcp.f32 %v1574_v36 }
 0x5dc   : > { %v1579_v37 = vpop.permute.xlu0 %1578 }
 0x5dd   : > { %v1584_v39 = vsel %vm1349_vm5, %v1579_v37, 0 }
 0x5de   : > { %2991 = vmatpush3.bf16.msra.mxu0 %v1584_v39 }
 0x5df   : > { %3002 = vmatprep.subr.bf16.mxu0 %v3267_v38 }
 0x5e0   : > { %v1693_v25 = vpop.xlane.xlu1 %1692 }
 0x5e1   : > { %3194 = vrcp.f32 %v1693_v25 }
 0x5e3   : > { %v3193_v40 = vpop.eup %3192 }
 0x5e4   : > { %v1576_v41 = vmul.f32 %v3193_v40, %v3672_v63 }
 0x5e6   : > { %v1577_v42 = vpack.c.bf16 %v1576_v41, %v1576_v41 }
 0x5e8   : > { %2993 = vmatmul.mubr.msk.bf16.vlgmr.msra.gmra.mrb[20].mxu0 %vm1285_vm4, %v1577_v42 }
 0x5e9   : > { %3004 = vmatprep.mubr.msk.bf16.mxu0 %vm3268_vm3, %v3267_v38 }
 0x5eb   : > { %v3195_v44 = vpop.eup %3194 }
 0x5ec   : > { %v1695_v46 = vmul.f32 %v3195_v44, %v3676_v1 }
 0x5ee   : > { %v1696_v49 = vpack.c.bf16 %v1695_v46, %v1695_v46 }
 0x5f0   : > { %v1932_v43 = vpop.xlane.xlu1 %1931 }
 0x5f8   : > { %v2052_v45 = vpop.xlane.xlu1 %2051 }
 0x5fc   : > { %v1698_v47 = vpop.permute.xlu1 %1697 }
 0x5fd   : > { %v1703_v48 = vsel %vm1349_vm5, %v1698_v47, 0 }
 0x5fe   : > { %3003 = vmatpush3.bf16.msra.mxu0 %v1703_v48 }
 0x5ff   : > { %3014 = vmatprep.subr.bf16.mxu0 %v3267_v38 }
 0x601   : > { %3005 = vmatmul.mubr.msk.bf16.vlgmr.msra.gmra.mrb[24].mxu0 %vm1285_vm4, %v1696_v49  ;;  %v3156_v49 = vld [vmem:[%s3443_s5] sm:$0xff]  }
 0x602   : > { %3016 = vmatprep.mubr.msk.bf16.mxu0 %vm3268_vm3, %v3267_v38  ;;  %3057 = vmatpush3.bf16.msra.mxu1 %v3156_v49  ;;  %v2856_v49 = vld [vmem:[%s862_s1] ss:$0 sm:$0xff] }
 0x603   : > { %3058 = vmatprep.subr.bf16.mxu1 %v3267_v38 }
 0x60d   : > { %v1813_v50 = vpop.xlane.xlu0 %1812 }
 0x60e   : > { %3196 = vrcp.f32 %v1813_v50  ;;  %v3157_v50 = vld [vmem:[%s3443_s5 + $0x8] sm:$0xff]  }
 0x60f   : > { %3198 = vrcp.f32 %v1932_v43  ;;  %3059 = vmatpush3.bf16.msra.mxu1 %v3157_v50 }
 0x610   : > { %3200 = vrcp.f32 %v2052_v45  ;;  %3072 = vmatprep.subr.bf16.mxu1 %v3267_v38 }
 0x611   : > { %v1818_v52 = vpop.permute.xlu0 %1817 }
 0x612   : > { %v1823_v53 = vsel %vm1349_vm5, %v1818_v52, 0 }
 0x613   : > { %3015 = vmatpush3.bf16.msra.mxu0 %v1823_v53 }
 0x614   : > { %3026 = vmatprep.subr.bf16.mxu0 %v3267_v38 }
 0x615   : > { %v1937_v56 = vpop.permute.xlu0 %1936 }
 0x616   : > { %v1942_v59 = vsel %vm1349_vm5, %v1937_v56, 0 }
 0x618   : > { %v3197_v54 = vpop.eup %3196 }
 0x619   : > { %v1815_v55 = vmul.f32 %v3197_v54, %v3189_v30  ;;  %v3199_v58 = vpop.eup %3198  ;;  %v2057_v61 = vpop.permute.xlu0 %2056 }
 0x61a   : > { %v1934_v60 = vmul.f32 %v3199_v58, %v3680_v10  ;;  %v3201_v62 = vpop.eup %3200  ;;  %v2062_v63 = vsel %vm1349_vm5, %v2057_v61, 0 }
 0x61b   : > { %v1816_v57 = vpack.c.bf16 %v1815_v55, %v1815_v55  ;;  %v2054_v0 = vmul.f32 %v3201_v62, %v3686_v13 }
 0x61c   : > { %v1935_v51 = vpack.c.bf16 %v1934_v60, %v1934_v60 }
 0x61d   : > { %3017 = vmatmul.mubr.msk.bf16.vlgmr.msra.gmra.mrb[28].mxu0 %vm1285_vm4, %v1816_v57  ;;  %v2176_v1 = vpop.permute.xlu0 %2175  ;;  %v2055_v2 = vpack.c.bf16 %v2054_v0, %v2054_v0 }
 0x61e   : > { %3027 = vmatpush3.bf16.msra.mxu0 %v1942_v59  ;;  %3028 = vmatprep.mubr.msk.bf16.mxu0 %vm3268_vm3, %v3267_v38  ;;  %v2181_v3 = vsel %vm1349_vm5, %v2176_v1, 0  ;;  %v2853_v1 = vld [vmem:[%s3916_s24] ss:$0 sm:$0xff] }
 0x61f   : > { %3038 = vmatprep.subr.bf16.mxu0 %v3267_v38 }
 0x625   : > { %3029 = vmatmul.mubr.msk.bf16.vlgmr.msra.gmra.mrb[32].mxu0 %vm1285_vm4, %v1935_v51 }
 0x626   : > { %3039 = vmatpush3.bf16.msra.mxu0 %v2062_v63  ;;  %3040 = vmatprep.mubr.msk.bf16.mxu0 %vm3268_vm3, %v3267_v38 }
 0x627   : > { %3050 = vmatprep.subr.bf16.mxu0 %v3267_v38 }
 0x62d   : > { %v2171_v4 = vpop.xlane.xlu1 %2170  ;;  %3041 = vmatmul.mubr.msk.bf16.vlgmr.msra.gmra.mrb[36].mxu0 %vm1285_vm4, %v2055_v2 }
 0x62e   : > { %3202 = vrcp.f32 %v2171_v4  ;;  %3051 = vmatpush3.bf16.msra.mxu0 %v2181_v3  ;;  %3052 = vmatprep.mubr.msk.bf16.mxu0 %vm3268_vm3, %v3267_v38 }
 0x62f   : > { %3064 = vmatprep.subr.bf16.mxu0 %v3267_v38 }
 0x638   : > { %v3203_v5 = vpop.eup %3202 }
 0x639   : > { %v2173_v6 = vmul.f32 %v3203_v5, %v3706_v34 }
 0x63b   : > { %v2174_v7 = vpack.c.bf16 %v2173_v6, %v2173_v6 }
 0x63d   : > { %3053 = vmatmul.mubr.msk.bf16.vlgmr.msra.gmra.mrb[40].mxu0 %vm1285_vm4, %v2174_v7 }
 0x63e   : > { %3068 = vmatprep.mubr.msk.bf16.mxu0 %vm3268_vm3, %v3267_v38 }
 0x648   : > { %v1387_v8 = vpop.f32.mrb[12].mxu0 }
 0x649   : > { %v1393_v9 = vpack.c.bf16 %v1387_v8, %v1387_v8  ;;  %v2970_v10 = vpop.f32.mrb[13].mxu0 }
 0x64a   : > { %v1390_v11 = vpop.f32.mrb[14].mxu0 }
 0x64b   : > { %1395 = vst.msk [vmem:[#allocation3] sm:$0xf] %vm1394_vm7, %v1393_v9  ;;  %v2971_v12 = vpop.f32.mrb[15].mxu0 }
 0x650   : > { %v1502_v13 = vpop.f32.mrb[16].mxu0 }
 0x651   : > { %v1508_v14 = vpack.c.bf16 %v1502_v13, %v1502_v13  ;;  %v2982_v15 = vpop.f32.mrb[17].mxu0 }
 0x652   : > { %v1505_v16 = vpop.f32.mrb[18].mxu0 }
 0x653   : > { %v1510_v17 = vrot.slane %v1508_v14, 4  ;;  %v2983_v18 = vpop.f32.mrb[19].mxu0 }
 0x655   : > { %1513 = vst.msk [vmem:[#allocation3] sm:$0xf0] %vm1512_vm8, %v1510_v17 }
 0x6bb   : > { %v1620_v19 = vpop.f32.mrb[20].mxu0 }
 0x6bc   : > { %v1626_v21 = vpack.c.bf16 %v1620_v19, %v1620_v19  ;;  %v2994_v22 = vpop.f32.mrb[21].mxu0  ;;  %v3158_v19 = vld [vmem:[%s3460_s29] sm:$0xff]  }
 0x6bd   : > { %v1623_v26 = vpop.f32.mrb[22].mxu0  ;;  %3065 = vmatpush3.bf16.msra.mxu0 %v3158_v19 }
 0x6be   : > { %1628 = vrot.lane.b32.xlu0 %v1626_v21, %s3273_s30  ;;  %v2995_v27 = vpop.f32.mrb[23].mxu0  ;;  %v3159_v21 = vld [vmem:[%s3460_s29 + $0x8] sm:$0xff]   ;;  %3066 = vmatprep.subr.bf16.mxu0 %v3267_v38 }
 0x6c1   : > { %3067 = vmatpush3.bf16.msra.mxu0 %v3159_v21 }
 0x6d4   : > { %v1739_v20 = vpop.f32.mrb[24].mxu0 }
 0x6d5   : > { %v1745_v28 = vpack.c.bf16 %v1739_v20, %v1739_v20  ;;  %v3006_v29 = vpop.f32.mrb[25].mxu0 }
 0x6d6   : > { %v1742_v30 = vpop.f32.mrb[26].mxu0 }
 0x6d7   : > { %v1747_v31 = vrot.slane %v1745_v28, 4  ;;  %v3007_v32 = vpop.f32.mrb[27].mxu0 }
 0x6d8   : > { %v2854_v32 = vld [vmem:[%s851_s3] ss:$0 sm:$0xff] }
 0x6d9   : > { %1748 = vrot.lane.b32.xlu0 %v1747_v31, %s3273_s30 }
 0x6f0   : > { %v1859_v33 = vpop.f32.mrb[28].mxu0 }
 0x6f1   : > { %v1865_v34 = vpack.c.bf16 %v1859_v33, %v1859_v33  ;;  %v3018_v35 = vpop.f32.mrb[29].mxu0 }
 0x6f2   : > { %v1862_v36 = vpop.f32.mrb[30].mxu0 }
 0x6f3   : > { %1867 = vrot.lane.b32.xlu0 %v1865_v34, %s3274_s4  ;;  %v3019_v37 = vpop.f32.mrb[31].mxu0  ;;  %v2855_v36 = vld [vmem:[%s854_s9] ss:$0 sm:$0xff] }
 0x6f8   : > { %v1978_v39 = vpop.f32.mrb[32].mxu0 }
 0x6f9   : > { %v1984_v40 = vpack.c.bf16 %v1978_v39, %v1978_v39  ;;  %v3030_v41 = vpop.f32.mrb[33].mxu0 }
 0x6fa   : > { %v1981_v42 = vpop.f32.mrb[34].mxu0 }
 0x6fb   : > { %v1986_v25 = vrot.slane %v1984_v40, 4  ;;  %v3031_v43 = vpop.f32.mrb[35].mxu0  ;;  %v3160_v42 = vld [vmem:[%s3470_s7] sm:$0xff]  }
 0x6fc   : > { %v3162_v43 = vld [vmem:[%s3470_s7 + $0x10] sm:$0xff]  }
 0x6fd   : > { %1987 = vrot.lane.b32.xlu0 %v1986_v25, %s3274_s4  ;;  %v3161_v25 = vld [vmem:[%s3470_s7 + $0x8] sm:$0xff]  }
 0x700   : > { %v2098_v44 = vpop.f32.mrb[36].mxu0 }
 0x701   : > { %v2104_v45 = vpack.c.bf16 %v2098_v44, %v2098_v44  ;;  %v3042_v46 = vpop.f32.mrb[37].mxu0  ;;  %v3163_v44 = vld [vmem:[%s3470_s7 + $0x18] sm:$0xff]  }
 0x702   : > { %v2101_v47 = vpop.f32.mrb[38].mxu0  ;;  %v3165_v46 = vld [vmem:[%s3470_s7 + $0x28] sm:$0xff]  }
 0x703   : > { %2106 = vrot.lane.b32.xlu0 %v2104_v45, %s3275_s20  ;;  %v3043_v48 = vpop.f32.mrb[39].mxu0  ;;  %v3164_v45 = vld [vmem:[%s3470_s7 + $0x20] sm:$0xff]   ;;  %v3166_v47 = vld [vmem:[%s3470_s7 + $0x30] sm:$0xff]  }
 0x704   : > { %v3167_v48 = vld [vmem:[%s3470_s7 + $0x38] sm:$0xff]  }
 0x710   : > { %v2217_v52 = vpop.f32.mrb[40].mxu0 }
 0x711   : > { %v2223_v53 = vpack.c.bf16 %v2217_v52, %v2217_v52  ;;  %v3054_v54 = vpop.f32.mrb[41].mxu0 }
 0x712   : > { %v2220_v55 = vpop.f32.mrb[42].mxu0 }
 0x713   : > { %v2225_v56 = vrot.slane %v2223_v53, 4  ;;  %v3055_v57 = vpop.f32.mrb[43].mxu0 }
 0x715   : > { %2226 = vrot.lane.b32.xlu1 %v2225_v56, %s3275_s20 }
 0x730   : > { %v1629_v58 = vpop.permute.xlu0 %1628 }
 0x731   : > { %1632 = vst.msk [vmem:[#allocation3] sm:$0xf] %vm1631_vm9, %v1629_v58 }
 0x74b   : > { %v1749_v59 = vpop.permute.xlu0 %1748 }
 0x74c   : > { %1752 = vst.msk [vmem:[#allocation3] sm:$0xf0] %vm1751_vm10, %v1749_v59 }
 0x765   : > { %v1868_v60 = vpop.permute.xlu0 %1867 }
 0x766   : > { %1871 = vst.msk [vmem:[#allocation3] sm:$0xf] %vm1870_vm11, %v1868_v60 }
 0x76f   : > { %v1988_v61 = vpop.permute.xlu0 %1987 }
 0x770   : > { %1991 = vst.msk [vmem:[#allocation3] sm:$0xf0] %vm1990_vm12, %v1988_v61 }
 0x775   : > { %v2107_v51 = vpop.permute.xlu0 %2106 }
 0x776   : > { %2110 = vst.msk [vmem:[#allocation3] sm:$0xf] %vm2109_vm13, %v2107_v51 }
 0x787   : > { %v2227_v62 = vpop.permute.xlu1 %2226 }
 0x788   : > { %2230 = vst.msk [vmem:[#allocation3] sm:$0xf0] %vm2229_vm14, %v2227_v62 }
 0x78f   : > { %v2231_v63 = vld [vmem:[#allocation3] sm:$0xff] }
 0x790   : > { %3061 = vmatmul.mubr.msk.bf16.vlgmr.msra.gmra.mrb[32].mxu1 %vm1042_vm2, %v2231_v63 }
 0x791   : > { %3088 = vmatprep.mubr.msk.bf16.mxu1 %vm3268_vm3, %v3267_v38  ;;  %3073 = vmatpush3.bf16.msra.mxu1 %v3160_v42 }
 0x792   : > { %3074 = vmatprep.subr.bf16.mxu1 %v3267_v38 }
 0x795   : > { %3075 = vmatpush3.bf16.msra.mxu1 %v3161_v25 }
 0x796   : > { %3076 = vmatprep.subr.bf16.mxu1 %v3267_v38 }
 0x799   : > { %3077 = vmatpush3.bf16.msra.mxu1 %v3162_v43 }
 0x79a   : > { %3078 = vmatprep.subr.bf16.mxu1 %v3267_v38 }
 0x79d   : > { %3079 = vmatpush3.bf16.msra.mxu1 %v3163_v44 }
 0x79e   : > { %3080 = vmatprep.subr.bf16.mxu1 %v3267_v38 }
 0x7a1   : > { %3081 = vmatpush3.bf16.msra.mxu1 %v3164_v45 }
 0x7a2   : > { %3082 = vmatprep.subr.bf16.mxu1 %v3267_v38 }
 0x7a5   : > { %3083 = vmatpush3.bf16.msra.mxu1 %v3165_v46 }
 0x7a6   : > { %3084 = vmatprep.subr.bf16.mxu1 %v3267_v38 }
 0x7a9   : > { %3085 = vmatpush3.bf16.msra.mxu1 %v3166_v47 }
 0x7aa   : > { %3086 = vmatprep.subr.bf16.mxu1 %v3267_v38 }
 0x7ad   : > { %3087 = vmatpush3.bf16.msra.mxu1 %v3167_v48 }
 0x863   : > { %v2285_v0 = vpop.f32.mrb[32].mxu1 }
 0x864   : > { %v2292_v2 = vadd.f32 %v2285_v0, %v3525_v23  ;;  %v3062_v3 = vpop.f32.mrb[33].mxu1 }
 0x865   : > { %v2288_v4 = vpop.f32.mrb[34].mxu1 }
 0x866   : > { %v3761_v5 = vadd.f32 %v2853_v1, %v2292_v2  ;;  %v2293_v6 = vadd.f32 %v2288_v4, %v3527_v24  ;;  %v3063_v7 = vpop.f32.mrb[35].mxu1 }
 0x868   : > { %v3764_v8 = vadd.f32 %v2853_v1, %v2293_v6  ;;  %v2305_v9 = vsel %vm1042_vm2, %v3761_v5, 0.0 }
 0x869   : > { %2306 = vadd.xlane.f32.xlu0 %v2305_v9 }
 0x86a   : > { %v2308_v10 = vsel %vm1042_vm2, %v3764_v8, 0.0 }
 0x86b   : > { %2309 = vadd.xlane.f32.xlu1 %v2308_v10 }
 0x8f6   : > { %v2307_v23 = vpop.xlane.xlu0 %2306 }
 0x8f7   : > { %v2311_v11 = vmul.f32 0.03125, %v2307_v23 }
 0x8f8   : > { %v2310_v12 = vpop.xlane.xlu1 %2309 }
 0x8f9   : > { %v2313_v13 = vsub.f32 %v3761_v5, %v2311_v11  ;;  %v2312_v14 = vmul.f32 0.03125, %v2310_v12  ;;  %v2868_v12 = vld [vmem:[%s870_s27] ss:$0 sm:$0xff] }
 0x8fb   : > { %v2314_v24 = vsub.f32 %v3764_v8, %v2312_v14  ;;  %v2315_v15 = vmul.f32 %v2313_v13, %v2313_v13 }
 0x8fd   : > { %v2317_v16 = vsel %vm1042_vm2, %v2315_v15, 0.0  ;;  %v2316_v17 = vmul.f32 %v2314_v24, %v2314_v24 }
 0x8fe   : > { %2318 = vadd.xlane.f32.xlu0 %v2317_v16 }
 0x8ff   : > { %v2320_v18 = vsel %vm1042_vm2, %v2316_v17, 0.0 }
 0x902   : > { %2321 = vadd.xlane.f32.xlu0 %v2320_v18 }
 0x98b   : > { %v2319_v22 = vpop.xlane.xlu0 %2318 }
 0x98c   : > { %v2323_v26 = vmul.f32 0.03125, %v2319_v22 }
 0x98e   : > { %v2325_v27 = vadd.f32 1e-06, %v2323_v26 }
 0x98f   : > { %v2322_v20 = vpop.xlane.xlu0 %2321 }
 0x990   : > { %3204 = vrsqrt.f32 %v2325_v27  ;;  %v2324_v28 = vmul.f32 0.03125, %v2322_v20 }
 0x992   : > { %v2326_v29 = vadd.f32 1e-06, %v2324_v28 }
 0x994   : > { %3206 = vrsqrt.f32 %v2326_v29 }
 0x99a   : > { %v3205_v30 = vpop.eup %3204 }
 0x99b   : > { %v2329_v31 = vmul.f32 %v3205_v30, %v2313_v13 }
 0x99d   : > { %v2337_v34 = vmul.f32 %v2854_v32, %v2329_v31 }
 0x99e   : > { %v3207_v33 = vpop.eup %3206 }
 0x99f   : > { %v2330_v35 = vmul.f32 %v3207_v33, %v2314_v24  ;;  %v2345_v39 = vadd.f32 %v2855_v36, %v2337_v34 }
 0x9a1   : > { %v2338_v37 = vmul.f32 %v2854_v32, %v2330_v35 }
 0x9a3   : > { %v2346_v40 = vadd.f32 %v2855_v36, %v2338_v37 }
 0x9a5   : > { %v2347_v41 = vpack.c.bf16 %v2346_v40, %v2345_v39 }
 0x9a7   : > { %3069 = vmatmul.mubr.msk.bf16.vlgmr.msra.gmra.mrb[44].mxu0 %vm1042_vm2, %v2347_v41 }
 0xa7a   : > { %v2424_v50 = vpop.f32.mrb[44].mxu0 }
 0xa7b   : > { %v2425_v52 = vadd.f32 %v2856_v49, %v2424_v50  ;;  %v3070_v53 = vpop.f32.mrb[45].mxu0 }
 0xa7c   : > { %v2427_v54 = vpop.f32.mrb[46].mxu0 }
 0xa7d   : > { %v2433_v55 = vmul.f32 0.044715, %v2425_v52  ;;  %v2428_v56 = vadd.f32 %v2856_v49, %v2427_v54  ;;  %v3071_v57 = vpop.f32.mrb[47].mxu0  ;;  %v2431_v4 = vmul.f32 0.5, %v2425_v52 }
 0xa7f   : > { %v2435_v58 = vmul.f32 %v2433_v55, %v2425_v52  ;;  %v2434_v59 = vmul.f32 0.044715, %v2428_v56  ;;  %v2432_v6 = vmul.f32 0.5, %v2428_v56 }
 0xa81   : > { %v2437_v60 = vmul.f32 %v2435_v58, %v2425_v52  ;;  %v2436_v61 = vmul.f32 %v2434_v59, %v2428_v56 }
 0xa83   : > { %v2439_v51 = vadd.f32 %v2437_v60, %v2425_v52  ;;  %v2438_v62 = vmul.f32 %v2436_v61, %v2428_v56 }
 0xa85   : > { %v2441_v38 = vmul.f32 0.7978846, %v2439_v51  ;;  %v2440_v63 = vadd.f32 %v2438_v62, %v2428_v56 }
 0xa87   : > { %3208 = vtanh.f32 %v2441_v38  ;;  %v2442_v0 = vmul.f32 0.7978846, %v2440_v63 }
 0xa89   : > { %3210 = vtanh.f32 %v2442_v0 }
 0xa91   : > { %v3209_v1 = vpop.eup %3208 }
 0xa92   : > { %v2445_v2 = vadd.f32 1.0, %v3209_v1 }
 0xa93   : > { %v3211_v3 = vpop.eup %3210 }
 0xa94   : > { %v2446_v7 = vadd.f32 1.0, %v3211_v3  ;;  %v2447_v9 = vmul.f32 %v2445_v2, %v2431_v4 }
 0xa96   : > { %v2448_v10 = vmul.f32 %v2446_v7, %v2432_v6 }
 0xa98   : > { %v2449_v23 = vpack.c.bf16 %v2448_v10, %v2447_v9 }
 0xa9a   : > { %3089 = vmatmul.mubr.bf16.vlgmr.msra.gmra.mrb[36].mxu1 %v2449_v23 }
 0xb6d   : > { %v2532_v11 = vpop.f32.mrb[36].mxu1 }
 0xb6e   : > { %v2539_v13 = vadd.f32 %v2532_v11, %v3761_v5  ;;  %v3090_v14 = vpop.f32.mrb[37].mxu1  ;;  %2555 = sbr.rel (%p2869_p6) target bundleno = 2934 (0xb76), region = 104 }
 0xb6f   : > { %v2535_v24 = vpop.f32.mrb[38].mxu1 }
 0xb70   : > { %v2548_v15 = vadd.f32 %v2868_v12, %v2539_v13  ;;  %v2540_v16 = vadd.f32 %v2535_v24, %v3764_v8  ;;  %v3091_v17 = vpop.f32.mrb[39].mxu1 }
 0xb72   : > { %2550 = vst.msk [vmem:[#allocation2] sm:$0xff] %vm1042_vm2, %v2548_v15  ;;  %v2549_v18 = vadd.f32 %v2868_v12, %v2540_v16 }
 0xb73   : > { %2557 = vst.msk [vmem:[#allocation4] sm:$0xf] (!%p2869_p6), %vm2556_vm15, %v2548_v15 }
 0xb74   : > { %2551 = vst.msk [vmem:[#allocation2 + $0x8] sm:$0xff] %vm1042_vm2, %v2549_v18 }
 0xb75   : > { %2559 = vst.msk [vmem:[#allocation4 + $0x4] sm:$0xf] %vm2556_vm15, %v2549_v18 }
 0xb76 PF: > { %s3918_s22 = sld [smem:[#allocation9_spill]]  ;;  %s3276_s19 = smov [#allocation4]  }
 0xb77   : > { %s2569_s30 = sshll.u32 %s3276_s19, 4  ;;  %s2570_s30 = int_to_ptr.vmem [resolvable:$true] %s2569_s30 }
 0xb78   : > { %s3212_s4 = scalar_lea.vmem %s2570_s30, 128  ;;  %p3219_p11 = scmp.lt.s32.totalorder %s2570_s30, %s2570_s30 }
 0xb79   : > { %p3213_p8 = scmp.ne.s32.totalorder %s2570_s30, %s3212_s4  ;;  %p3220_p12 = scmp.lt.s32.totalorder %s3212_s4, %s3212_s4 }
 0xb7b   : > { %p3221_p13 = por %p3220_p12, %p3219_p11 }
 0xb7c   : > { %s3919_s27 = sadd.s32 4294967295, %s3918_s22  }
 0xb7d   : > { %p3820_p7 = scmp.eq.s32.totalorder %s3919_s27, 1 }
 0xb7f   : > { %p3214_p9 = pnand %p3213_p8, %p3820_p7 }
 0xb81   : > { %p3215_p10 = pneg %p3214_p9 }
 0xb83   : > { %p3222_p0 = pnand %p3221_p13, %p3215_p10 }
 0xb85   : > { %3225 = shalt.err (!%p3222_p0)
}
 0xb86   : > { %s3921_s25 = sld [smem:[#allocation21_spill]] }
 0xb8c   : > { %s3226_s24 = scalar_lea.hbm %s3921_s25, 128 }
 0xb8d   : > { %p3227_p1 = scmp.ne.s32.totalorder %s3921_s25, %s3226_s24  ;;  %p3232_p4 = scmp.lt.u32.totalorder %s3226_s24, %s3921_s25 }
 0xb8f   : > { %p3228_p2 = pnand %p3227_p1, %p3820_p7 }
 0xb91   : > { %p3229_p3 = pneg %p3228_p2 }
 0xb93   : > { %p3234_p5 = pnand %p3232_p4, %p3229_p3 }
 0xb95   : > { %3237 = shalt.err (!%p3234_p5)
}
 0xb96   : > { %s3277_s9 = smov 64   ;;  %s3278_s3 = smov 4  }
 0xb97   : > { %3093 = dma.vmem_to_hbm [thread:$0]  (%p3820_p7), %s2570_s30, 128, %s3921_s25, [#allocation5], %s3277_s9, %s3277_s9, %s3278_s3  }
 0xb98   : > { %3251 = dma.done.wait (%p3820_p7), [#allocation5], 128  }
 0xb99   : > { %3253 = vsyncadd (%p3820_p7), [#allocation5], 4294967168 }
 0xb9a PF: > { %s3922_s11 = sld [smem:[#allocation9_spill]]  ;;  %s3923_s0 = sld [smem:[#allocation8_spill]] }
 0xb9b   : > { %s3924_s30 = sld [smem:[#allocation10_spill]] }
 0xba0   : > { %s30_s20 = sadd.s32 1, %s3922_s11  }
 0xba1   : > { %p27_p6 = scmp.ge.s32.totalorder %s30_s20, 4  }
 0xba3   :  { %29 = sbr.rel (!%p27_p6) target bundleno = 14 (0xe), region = 181 }
 0xbaa   :  { %2585 = vsyncpa [#allocation5], 1 }
 0xbab   :  { %2587 = vsyncpa [#allocation5 + $0x1], 1 }

</bundles_post_ra>
